<compile_context>
chip_gen: v6e
topology: v6e:2x2x1
jax: 0.10.0
libtpu: 0.0.40
codegen_flags: <defaults>
</compile_context>

<pallas_src>
import jax
import jax.numpy as jnp
from jax import lax
from jax.experimental import pallas as pl
from jax.experimental.pallas import tpu as pltpu


def _gafn_kernel(x_ref, c_ref,
                 wq_ref, bq_ref,
                 wv_ref, bv_ref,
                 wcv_ref, wcq_ref, bc_ref,
                 wa_ref, ba_ref,
                 o_ref):
    """One (BN, L, D) block of batch elements per grid step.

    x_ref          : (BN, L, D)  input, native dtype (cast to bf16 in-kernel)
    c_ref          : (BN, L, D)  centroids, f32 (reused for final attn * c)
    wq, wv         : (D, D)      q_proj1.weight.T / v_proj1.weight.T (bf16)
    wcv, wcq       : (D, D)      cat1.weight.T split into [v | q*v] halves (bf16)
    bq, bv, bc     : (1, D)      f32 biases
    wa             : (1, D)      attn1.weight as a row (f32)
    ba             : (1,)        attn1 bias, SMEM scalar
    o_ref          : (BN, L, D)
    """
    BN, L, D = c_ref.shape
    mm_dtype = wq_ref.dtype

    # dropout1 == identity (eval mode). bf16 cast happens here, not in HBM.
    x2 = x_ref[...].reshape(BN * L, D).astype(mm_dtype)
    c3 = c_ref[...].astype(jnp.float32)                  # kept f32 for attn * c
    c2 = c3.reshape(BN * L, D).astype(mm_dtype)

    # q_proj1(x_temp) / v_proj1(centroids): bf16 operands, f32 MXU accumulate.
    q = jnp.dot(x2, wq_ref[...], preferred_element_type=jnp.float32) + bq_ref[...]
    v = jnp.dot(c2, wv_ref[...], preferred_element_type=jnp.float32) + bv_ref[...]

    # cat1(concat([v, q*v], -1)) as two accumulating (D, D) matmuls; avoids
    # materializing the (BN*L, 2D) concat in VMEM.
    g = (jnp.dot(v.astype(mm_dtype), wcv_ref[...],
                 preferred_element_type=jnp.float32)
         + jnp.dot((q * v).astype(mm_dtype), wcq_ref[...],
                   preferred_element_type=jnp.float32)
         + bc_ref[...])

    # Exact GELU (matches nn.GELU default), f32 on the VPU.
    g = 0.5 * g * (1.0 + lax.erf(g * 0.7071067811865476))

    # attn1 (out_features == 1): elementwise multiply + lane reduction.
    g3 = g.reshape(BN, L, D)
    a = jnp.sum(g3 * wa_ref[...], axis=-1, keepdims=True) + ba_ref[0]  # (BN, L, 1)

    # softmax over the sequence (L) axis, per batch element.
    a = a - jnp.max(a, axis=1, keepdims=True)
    e = jnp.exp(a)
    a = e * pl.reciprocal(jnp.sum(e, axis=1, keepdims=True), approx=True)

    # combined_concat = attn * centroids (f32).
    o_ref[...] = (a * c3).astype(o_ref.dtype)


def _choose_block_n(N, L, D, block_n=None, block_budget_bytes=32 << 20):
    """Pick how many batch elements to process per grid step."""
    # Honest per-batch-element VMEM footprint:
    #   * double-buffered f32 I/O blocks (x + c + out): 2 * 3 * 4 bytes/elem
    #   * live in-kernel intermediates (q, v, q*v, g in f32 + bf16 casts):
    #     ~24 bytes/elem
    per_elem = (2 * 3 * 4 + 24) * L * D
    if block_n is None:
        block_n = max(1, block_budget_bytes // per_elem)
        # Fill the MXU M dimension (>= 128 rows per push) when possible.
        block_n = max(block_n, -(-128 // L))
    block_n = max(1, min(int(block_n), N))
    # If the whole batch fits in one grid step, split into two so v7x's second
    # TensorCore gets work; one extra ~0.35 us step is noise on 1-TC chips.
    if block_n == N and N >= 2:
        block_n = -(-N // 2)
    return block_n


def gafn_four_v3_self(x, cluster, params, *, block_n=None, use_bf16_matmul=True):
    """x, cluster: (N, C, H, W) with W == module_dim. Returns (N, C, H, W)."""
    N, C, H, W = x.shape
    L, D = C * H, W
    out_dtype = x.dtype
    mm_dtype = jnp.bfloat16 if use_bf16_matmul else jnp.float32

    # Inputs keep their native dtype: no wrapper-side bf16 round trip.
    x_r = x.reshape(N, L, D)
    c_r = cluster.reshape(N, L, D).astype(jnp.float32)

    # Pre-transpose PyTorch Linear weights (out, in) -> (in, out).
    wq = params["q_proj1_w"].T.astype(mm_dtype)              # (D, D)
    wv = params["v_proj1_w"].T.astype(mm_dtype)              # (D, D)
    wcv = params["cat1_w"][:, :D].T.astype(mm_dtype)         # (D, D) acts on v
    wcq = params["cat1_w"][:, D:].T.astype(mm_dtype)         # (D, D) acts on q*v
    wa = params["attn1_w"].reshape(1, D).astype(jnp.float32)
    bq = params["q_proj1_b"].reshape(1, D).astype(jnp.float32)
    bv = params["v_proj1_b"].reshape(1, D).astype(jnp.float32)
    bc = params["cat1_b"].reshape(1, D).astype(jnp.float32)
    ba = params["attn1_b"].reshape(1).astype(jnp.float32)

    bn = _choose_block_n(N, L, D, block_n)
    n_pad = -(-N // bn) * bn
    if n_pad != N:
        # Pad the batch instead of shrinking bn for awkward N; padded rows
        # have zero centroids -> zero output, and are sliced off below.
        pad = ((0, n_pad - N), (0, 0), (0, 0))
        x_r = jnp.pad(x_r, pad)
        c_r = jnp.pad(c_r, pad)
    grid = (n_pad // bn,)

    seq_spec = pl.BlockSpec((bn, L, D), lambda n: (n, 0, 0))
    mat_spec = pl.BlockSpec((D, D), lambda n: (0, 0))
    vec_spec = pl.BlockSpec((1, D), lambda n: (0, 0))
    smem_spec = pl.BlockSpec(memory_space=pltpu.MemorySpace.SMEM)

    itemsize = lambda a: int(jnp.dtype(a.dtype).itemsize)
    weights = (wq, wv, wcv, wcq, bq, bv, bc, wa, ba)
    cost = pl.CostEstimate(
        flops=int(2 * n_pad * L * D * (4 * D + 1)),
        transcendentals=int(n_pad * L * (D + 1)),
        bytes_accessed=int(
            x_r.size * itemsize(x_r)
            + c_r.size * itemsize(c_r)
            + n_pad * L * D * int(jnp.dtype(out_dtype).itemsize)
            + sum(int(a.size) * itemsize(a) for a in weights)),
    )

    out = pl.pallas_call(
        _gafn_kernel,
        out_shape=jax.ShapeDtypeStruct((n_pad, L, D), out_dtype),
        grid_spec=pltpu.PrefetchScalarGridSpec(
            num_scalar_prefetch=0,
            grid=grid,
            in_specs=[seq_spec, seq_spec,
                      mat_spec, vec_spec,
                      mat_spec, vec_spec,
                      mat_spec, mat_spec, vec_spec,
                      vec_spec, smem_spec],
            out_specs=seq_spec,
        ),
        compiler_params=pltpu.CompilerParams(
            dimension_semantics=("parallel",),
            vmem_limit_bytes=48 << 20),
        cost_estimate=cost,
    )(x_r, c_r, wq, bq, wv, bv, wcv, wcq, bc, wa, ba)

    if n_pad != N:
        out = out[:N]
    return out.reshape(N, C, H, W)


def _reference(x, cluster, params):
    """Plain-JAX f32 reference of the PyTorch forward (eval mode)."""
    N, C, H, W = x.shape
    L, D = C * H, W
    xr = x.reshape(N, L, D).astype(jnp.float32)
    cr = cluster.reshape(N, L, D).astype(jnp.float32)

    def lin(t, w, b):
        return t @ w.T + b

    q = lin(xr, params["q_proj1_w"], params["q_proj1_b"])
    v = lin(cr, params["v_proj1_w"], params["v_proj1_b"])
    vq = jnp.concatenate([v, q * v], axis=-1)
    g = lin(vq, params["cat1_w"], params["cat1_b"])
    g = 0.5 * g * (1.0 + lax.erf(g * 0.7071067811865476))
    a = lin(g, params["attn1_w"], params["attn1_b"])
    a = jax.nn.softmax(a, axis=1)
    return (a * cr).reshape(N, C, H, W).astype(x.dtype)


def _init_params(key, D):
    ks = jax.random.split(key, 8)
    s = 1.0 / jnp.sqrt(D)
    return {
        "q_proj1_w": jax.random.uniform(ks[0], (D, D), jnp.float32, -s, s),
        "q_proj1_b": jax.random.uniform(ks[1], (D,), jnp.float32, -s, s),
        "v_proj1_w": jax.random.uniform(ks[2], (D, D), jnp.float32, -s, s),
        "v_proj1_b": jax.random.uniform(ks[3], (D,), jnp.float32, -s, s),
        "cat1_w": jax.random.uniform(ks[4], (D, 2 * D), jnp.float32, -s, s),
        "cat1_b": jax.random.uniform(ks[5], (D,), jnp.float32, -s, s),
        "attn1_w": jax.random.uniform(ks[6], (1, D), jnp.float32, -s, s),
        "attn1_b": jax.random.uniform(ks[7], (1,), jnp.float32, -s, s),
    }


if __name__ == "__main__":
    # Small shapes consistent with the forward: last dim == module_dim.
    N, C, H, D = 8, 4, 8, 128          # module_dim = 128, L = C*H = 32
    key = jax.random.PRNGKey(0)
    kx, kc, kp = jax.random.split(key, 3)

    x = jax.random.normal(kx, (N, C, H, D), jnp.float32)
    cluster = jax.random.normal(kc, (N, C, H, D), jnp.float32)
    params = _init_params(kp, D)

    out = gafn_four_v3_self(x, cluster, params)
    out = jax.block_until_ready(out)

    ref = _reference(x, cluster, params)
    assert out.shape == (N, C, H, D)
    # bf16 matmul operands (f32 accumulation) -> loosened tolerance vs f32 ref.
    assert jnp.allclose(out, ref, rtol=1e-2, atol=1e-2), "mismatch vs reference"

    print("KERNEL_OK")
</pallas_src>

<mosaic_0001>
module attributes {stable_mosaic.version = 11 : i64} {
  func.func @_gafn_kernel(%arg0: i32, %arg1: memref<4x32x128xf32, #tpu.memory_space<vmem>>, %arg2: memref<4x32x128xf32, #tpu.memory_space<vmem>>, %arg3: memref<128x128xbf16, #tpu.memory_space<vmem>>, %arg4: memref<1x128xf32, #tpu.memory_space<vmem>>, %arg5: memref<128x128xbf16, #tpu.memory_space<vmem>>, %arg6: memref<1x128xf32, #tpu.memory_space<vmem>>, %arg7: memref<128x128xbf16, #tpu.memory_space<vmem>>, %arg8: memref<128x128xbf16, #tpu.memory_space<vmem>>, %arg9: memref<1x128xf32, #tpu.memory_space<vmem>>, %arg10: memref<1x128xf32, #tpu.memory_space<vmem>>, %arg11: memref<1xf32, #tpu.memory_space<smem>>, %arg12: memref<4x32x128xf32, #tpu.memory_space<vmem>>) attributes {dimension_semantics = [#tpu.dimension_semantics<parallel>], iteration_bounds = array<i64: 2>, scalar_prefetch = 0 : i64, scratch_operands = 0 : i64, tpu.core_type = #tpu.core_type<tc>, window_params = [{transform_indices = @transform_0, window_bounds = array<i64: 4, 32, 128>}, {transform_indices = @transform_1, window_bounds = array<i64: 4, 32, 128>}, {pipeline_mode = #tpu.pipeline_mode<synchronous>, transform_indices = @transform_2, window_bounds = array<i64: 128, 128>}, {pipeline_mode = #tpu.pipeline_mode<synchronous>, transform_indices = @transform_3, window_bounds = array<i64: 1, 128>}, {pipeline_mode = #tpu.pipeline_mode<synchronous>, transform_indices = @transform_4, window_bounds = array<i64: 128, 128>}, {pipeline_mode = #tpu.pipeline_mode<synchronous>, transform_indices = @transform_5, window_bounds = array<i64: 1, 128>}, {pipeline_mode = #tpu.pipeline_mode<synchronous>, transform_indices = @transform_6, window_bounds = array<i64: 128, 128>}, {pipeline_mode = #tpu.pipeline_mode<synchronous>, transform_indices = @transform_7, window_bounds = array<i64: 128, 128>}, {pipeline_mode = #tpu.pipeline_mode<synchronous>, transform_indices = @transform_8, window_bounds = array<i64: 1, 128>}, {pipeline_mode = #tpu.pipeline_mode<synchronous>, transform_indices = @transform_9, window_bounds = array<i64: 1, 128>}, {transform_indices = @transform_10, window_bounds = array<i64: 1>}, {transform_indices = @transform_11, window_bounds = array<i64: 4, 32, 128>}]} {
    %c0 = arith.constant 0 : index
    %c0_0 = arith.constant 0 : index
    %c0_1 = arith.constant 0 : index
    %0 = vector.load %arg1[%c0, %c0_0, %c0_1] : memref<4x32x128xf32, #tpu.memory_space<vmem>>, vector<4x32x128xf32>
    %1 = vector.shape_cast %0 : vector<4x32x128xf32> to vector<128x128xf32>
    %2 = arith.truncf %1 : vector<128x128xf32> to vector<128x128xbf16>
    %c0_2 = arith.constant 0 : index
    %c0_3 = arith.constant 0 : index
    %c0_4 = arith.constant 0 : index
    %3 = vector.load %arg2[%c0_2, %c0_3, %c0_4] : memref<4x32x128xf32, #tpu.memory_space<vmem>>, vector<4x32x128xf32>
    %4 = vector.shape_cast %3 : vector<4x32x128xf32> to vector<128x128xf32>
    %5 = arith.truncf %4 : vector<128x128xf32> to vector<128x128xbf16>
    %c0_5 = arith.constant 0 : index
    %c0_6 = arith.constant 0 : index
    %6 = vector.load %arg3[%c0_5, %c0_6] : memref<128x128xbf16, #tpu.memory_space<vmem>>, vector<128x128xbf16>
    %cst = arith.constant dense<0.000000e+00> : vector<128x128xf32>
    %7 = tpu.matmul %2, %6, %cst {dimension_numbers = #tpu.dot_dimension_numbers<[1], [0], [0], [1], [0, 0, 1, 1], [], []>} : vector<128x128xbf16>, vector<128x128xbf16>, vector<128x128xf32> -> vector<128x128xf32>
    %c0_7 = arith.constant 0 : index
    %c0_8 = arith.constant 0 : index
    %8 = vector.load %arg4[%c0_7, %c0_8] : memref<1x128xf32, #tpu.memory_space<vmem>>, vector<1x128xf32>
    %9 = vector.broadcast %8 : vector<1x128xf32> to vector<128x128xf32>
    %10 = arith.addf %7, %9 : vector<128x128xf32>
    %c0_9 = arith.constant 0 : index
    %c0_10 = arith.constant 0 : index
    %11 = vector.load %arg5[%c0_9, %c0_10] : memref<128x128xbf16, #tpu.memory_space<vmem>>, vector<128x128xbf16>
    %cst_11 = arith.constant dense<0.000000e+00> : vector<128x128xf32>
    %12 = tpu.matmul %5, %11, %cst_11 {dimension_numbers = #tpu.dot_dimension_numbers<[1], [0], [0], [1], [0, 0, 1, 1], [], []>} : vector<128x128xbf16>, vector<128x128xbf16>, vector<128x128xf32> -> vector<128x128xf32>
    %c0_12 = arith.constant 0 : index
    %c0_13 = arith.constant 0 : index
    %13 = vector.load %arg6[%c0_12, %c0_13] : memref<1x128xf32, #tpu.memory_space<vmem>>, vector<1x128xf32>
    %14 = vector.broadcast %13 : vector<1x128xf32> to vector<128x128xf32>
    %15 = arith.addf %12, %14 : vector<128x128xf32>
    %16 = arith.truncf %15 : vector<128x128xf32> to vector<128x128xbf16>
    %c0_14 = arith.constant 0 : index
    %c0_15 = arith.constant 0 : index
    %17 = vector.load %arg7[%c0_14, %c0_15] : memref<128x128xbf16, #tpu.memory_space<vmem>>, vector<128x128xbf16>
    %cst_16 = arith.constant dense<0.000000e+00> : vector<128x128xf32>
    %18 = tpu.matmul %16, %17, %cst_16 {dimension_numbers = #tpu.dot_dimension_numbers<[1], [0], [0], [1], [0, 0, 1, 1], [], []>} : vector<128x128xbf16>, vector<128x128xbf16>, vector<128x128xf32> -> vector<128x128xf32>
    %19 = arith.mulf %10, %15 : vector<128x128xf32>
    %20 = arith.truncf %19 : vector<128x128xf32> to vector<128x128xbf16>
    %c0_17 = arith.constant 0 : index
    %c0_18 = arith.constant 0 : index
    %21 = vector.load %arg8[%c0_17, %c0_18] : memref<128x128xbf16, #tpu.memory_space<vmem>>, vector<128x128xbf16>
    %cst_19 = arith.constant dense<0.000000e+00> : vector<128x128xf32>
    %22 = tpu.matmul %20, %21, %cst_19 {dimension_numbers = #tpu.dot_dimension_numbers<[1], [0], [0], [1], [0, 0, 1, 1], [], []>} : vector<128x128xbf16>, vector<128x128xbf16>, vector<128x128xf32> -> vector<128x128xf32>
    %23 = arith.addf %18, %22 : vector<128x128xf32>
    %c0_20 = arith.constant 0 : index
    %c0_21 = arith.constant 0 : index
    %24 = vector.load %arg9[%c0_20, %c0_21] : memref<1x128xf32, #tpu.memory_space<vmem>>, vector<1x128xf32>
    %25 = vector.broadcast %24 : vector<1x128xf32> to vector<128x128xf32>
    %26 = arith.addf %23, %25 : vector<128x128xf32>
    %cst_22 = arith.constant 5.000000e-01 : f32
    %27 = vector.broadcast %cst_22 : f32 to vector<128x128xf32>
    %28 = arith.mulf %27, %26 : vector<128x128xf32>
    %cst_23 = arith.constant 0.707106769 : f32
    %29 = vector.broadcast %cst_23 : f32 to vector<128x128xf32>
    %30 = arith.mulf %26, %29 : vector<128x128xf32>
    %31 = math.erf %30 : vector<128x128xf32>
    %cst_24 = arith.constant 1.000000e+00 : f32
    %32 = vector.broadcast %cst_24 : f32 to vector<128x128xf32>
    %33 = arith.addf %32, %31 : vector<128x128xf32>
    %34 = arith.mulf %28, %33 : vector<128x128xf32>
    %35 = vector.shape_cast %34 : vector<128x128xf32> to vector<4x32x128xf32>
    %c0_25 = arith.constant 0 : index
    %c0_26 = arith.constant 0 : index
    %36 = vector.load %arg10[%c0_25, %c0_26] : memref<1x128xf32, #tpu.memory_space<vmem>>, vector<1x128xf32>
    %37 = vector.shape_cast %36 : vector<1x128xf32> to vector<1x1x128xf32>
    %38 = vector.broadcast %37 : vector<1x1x128xf32> to vector<4x32x128xf32>
    %39 = arith.mulf %35, %38 : vector<4x32x128xf32>
    %cst_27 = arith.constant dense<0.000000e+00> : vector<4x32xf32>
    %40 = vector.multi_reduction <add>, %39, %cst_27 [2] : vector<4x32x128xf32> to vector<4x32xf32>
    %41 = vector.shape_cast %40 : vector<4x32xf32> to vector<4x32x1xf32>
    %c0_28 = arith.constant 0 : index
    %42 = memref.load %arg11[%c0_28] : memref<1xf32, #tpu.memory_space<smem>>
    %43 = vector.broadcast %42 : f32 to vector<4x32x1xf32>
    %44 = arith.addf %41, %43 : vector<4x32x1xf32>
    %cst_29 = arith.constant dense<0xFF800000> : vector<4x1xf32>
    %45 = vector.multi_reduction <maximumf>, %44, %cst_29 [1] : vector<4x32x1xf32> to vector<4x1xf32>
    %46 = vector.shape_cast %45 : vector<4x1xf32> to vector<4x1x1xf32>
    %47 = vector.broadcast %46 : vector<4x1x1xf32> to vector<4x32x1xf32>
    %48 = arith.subf %44, %47 : vector<4x32x1xf32>
    %49 = math.exp %48 : vector<4x32x1xf32>
    %cst_30 = arith.constant dense<0.000000e+00> : vector<4x1xf32>
    %50 = vector.multi_reduction <add>, %49, %cst_30 [1] : vector<4x32x1xf32> to vector<4x1xf32>
    %51 = vector.shape_cast %50 : vector<4x1xf32> to vector<4x1x1xf32>
    %52 = tpu.reciprocal %51 {approx = true} : vector<4x1x1xf32> -> vector<4x1x1xf32>
    %53 = vector.broadcast %52 : vector<4x1x1xf32> to vector<4x32x1xf32>
    %54 = arith.mulf %49, %53 : vector<4x32x1xf32>
    %55 = vector.broadcast %54 : vector<4x32x1xf32> to vector<4x32x128xf32>
    %56 = arith.mulf %55, %3 : vector<4x32x128xf32>
    %c0_31 = arith.constant 0 : index
    %c0_32 = arith.constant 0 : index
    %c0_33 = arith.constant 0 : index
    %57 = vector.load %arg12[%c0_31, %c0_32, %c0_33] : memref<4x32x128xf32, #tpu.memory_space<vmem>>, vector<4x32x128xf32>
    tpu.vector_store %arg12[%c0_31, %c0_32, %c0_33], %56 {strides = array<i32>} : memref<4x32x128xf32, #tpu.memory_space<vmem>>, vector<4x32x128xf32>,
    return
  }
  func.func @transform_0(%arg0: i32) -> (i32, i32, i32) {
    %c0_i32 = arith.constant 0 : i32
    %c0_i32_0 = arith.constant 0 : i32
    %c0_i32_1 = arith.constant 0 : i32
    return %arg0, %c0_i32, %c0_i32_0 : i32, i32, i32
  }
  func.func @transform_1(%arg0: i32) -> (i32, i32, i32) {
    %c0_i32 = arith.constant 0 : i32
    %c0_i32_0 = arith.constant 0 : i32
    %c0_i32_1 = arith.constant 0 : i32
    return %arg0, %c0_i32, %c0_i32_0 : i32, i32, i32
  }
  func.func @transform_2(%arg0: i32) -> (i32, i32) {
    %c0_i32 = arith.constant 0 : i32
    %c0_i32_0 = arith.constant 0 : i32
    %c0_i32_1 = arith.constant 0 : i32
    return %c0_i32, %c0_i32_0 : i32, i32
  }
  func.func @transform_3(%arg0: i32) -> (i32, i32) {
    %c0_i32 = arith.constant 0 : i32
    %c0_i32_0 = arith.constant 0 : i32
    %c0_i32_1 = arith.constant 0 : i32
    return %c0_i32, %c0_i32_0 : i32, i32
  }
  func.func @transform_4(%arg0: i32) -> (i32, i32) {
    %c0_i32 = arith.constant 0 : i32
    %c0_i32_0 = arith.constant 0 : i32
    %c0_i32_1 = arith.constant 0 : i32
    return %c0_i32, %c0_i32_0 : i32, i32
  }
  func.func @transform_5(%arg0: i32) -> (i32, i32) {
    %c0_i32 = arith.constant 0 : i32
    %c0_i32_0 = arith.constant 0 : i32
    %c0_i32_1 = arith.constant 0 : i32
    return %c0_i32, %c0_i32_0 : i32, i32
  }
  func.func @transform_6(%arg0: i32) -> (i32, i32) {
    %c0_i32 = arith.constant 0 : i32
    %c0_i32_0 = arith.constant 0 : i32
    %c0_i32_1 = arith.constant 0 : i32
    return %c0_i32, %c0_i32_0 : i32, i32
  }
  func.func @transform_7(%arg0: i32) -> (i32, i32) {
    %c0_i32 = arith.constant 0 : i32
    %c0_i32_0 = arith.constant 0 : i32
    %c0_i32_1 = arith.constant 0 : i32
    return %c0_i32, %c0_i32_0 : i32, i32
  }
  func.func @transform_8(%arg0: i32) -> (i32, i32) {
    %c0_i32 = arith.constant 0 : i32
    %c0_i32_0 = arith.constant 0 : i32
    %c0_i32_1 = arith.constant 0 : i32
    return %c0_i32, %c0_i32_0 : i32, i32
  }
  func.func @transform_9(%arg0: i32) -> (i32, i32) {
    %c0_i32 = arith.constant 0 : i32
    %c0_i32_0 = arith.constant 0 : i32
    %c0_i32_1 = arith.constant 0 : i32
    return %c0_i32, %c0_i32_0 : i32, i32
  }
  func.func @transform_10(%arg0: i32) -> i32 {
    %c0_i32 = arith.constant 0 : i32
    %c0_i32_0 = arith.constant 0 : i32
    return %c0_i32 : i32
  }
  func.func @transform_11(%arg0: i32) -> (i32, i32, i32) {
    %c0_i32 = arith.constant 0 : i32
    %c0_i32_0 = arith.constant 0 : i32
    %c0_i32_1 = arith.constant 0 : i32
    return %arg0, %c0_i32, %c0_i32_0 : i32, i32, i32
  }
}

</mosaic_0001>

<bundles_post_ra>
// kernel: tpu_custom_call.1
= control target key start
LH: loop header
LB: loop body
LE: loop exit
PB: predicated region body
PF: predicated region fallthrough
CT: control target
= control target key end

     0   :  { %s3127_s0 = inlined_call_operand.hbm [shape: f32[8,32,128], index: 0, kind: input, shape index: {}]   ;;  %s3128_s1 = inlined_call_operand.hbm [shape: f32[8,32,128], index: 1, kind: input, shape index: {}]   ;;  %s3129_s2 = inlined_call_operand.hbm [shape: bf16[128,128], index: 2, kind: input, shape index: {}]   ;;  %s3130_s3 = inlined_call_operand.vmem [shape: f32[1,128], index: 3, kind: input, shape index: {}]   ;;  %s3131_s4 = inlined_call_operand.hbm [shape: bf16[128,128], index: 4, kind: input, shape index: {}]   ;;  %s3132_s5 = inlined_call_operand.vmem [shape: f32[1,128], index: 5, kind: input, shape index: {}]   ;;  %s3133_s6 = inlined_call_operand.hbm [shape: bf16[128,128], index: 6, kind: input, shape index: {}]   ;;  %s3134_s7 = inlined_call_operand.hbm [shape: bf16[128,128], index: 7, kind: input, shape index: {}]   ;;  %s3135_s8 = inlined_call_operand.vmem [shape: f32[1,128], index: 8, kind: input, shape index: {}]   ;;  %s3136_s9 = inlined_call_operand.vmem [shape: f32[1,128], index: 9, kind: input, shape index: {}]   ;;  %s3137_s10 = inlined_call_operand.<no memory space> [shape: f32[1], index: 10, kind: input, shape index: {}]   ;;  %s3138_s11 = inlined_call_operand.hbm [shape: f32[8,32,128], index: 11, kind: output, shape index: {}]  }
   0x1   :  { %3144 = sst [smem:[#allocation23_spill]] %s3127_s0 }
   0x2   :  { %3145 = sst [smem:[#allocation24_spill]] %s3129_s2 }
   0x3   :  { %3146 = sst [smem:[#allocation25_spill]] %s3131_s4 }
   0x4   :  { %3147 = sst [smem:[#allocation26_spill]] %s3133_s6 }
   0x5   :  { %3148 = sst [smem:[#allocation27_spill]] %s3134_s7 }
   0x6   :  { %16 = sst [smem:[#allocation2]] %s3137_s10 }
   0x7   :  { %17 = vsyncpa [#allocation4], 0 }
   0x8   :  { %19 = vsyncpa [#allocation4 + $0x1], 0 }
   0x9   :  { %20 = vsyncpa [#allocation7], 0 }
   0xa   :  { %22 = vsyncpa [#allocation7 + $0x1], 0 }
   0xb   :  { %23 = vsyncpa [#allocation10], 0 }
   0xc   :  { %24 = vsyncpa [#allocation13], 0 }
   0xd   :  { %25 = vsyncpa [#allocation5], 0 }
   0xe   :  { %27 = vsyncpa [#allocation5 + $0x1], 0  ;;  %s2544_s19 = smov 0   ;;  %s2546_s20 = smov 0  }
   0xf   :  { %s2548_s21 = smov 0   ;;  %s2550_s22 = smov 0  }
  0x10 LB: > { %3149 = sst [smem:[#allocation21_spill]] %s2462_s21  ;;  %s2565_s10 = sadd.s32 4294967295, %s2466_s22   ;;  %s2466_s22 = sphi %s2550_s22, %s3177_s22   ;;  %s2462_s21 = sphi %s2548_s21, %s3174_s21   ;;  %s2458_s20 = sphi %s2546_s20, %s3176_s20   ;;  %s2454_s19 = sphi %s2544_s19, %s3175_s19  }
  0x11   : > { %s1745_s23 = sadd.s32 4294967294, %s2466_s22   ;;  %p53_p0 = scmp.ne.s32.totalorder %s2458_s20, %s2454_s19 }
  0x12   : > { %p3139_p1 = scmp.eq.s32.totalorder %s2565_s10, 0  ;;  %p292_p2 = scmp.eq.s32.totalorder %s2565_s10, 1 }
  0x13   : > { %p298_p3 = scmp.eq.s32.totalorder %s1745_s23, 1  ;;  %p1746_p5 = scmp.ge.s32.totalorder %s2466_s22, 1 }
  0x14   : > { %p2574_p4 = por %p3139_p1, %p53_p0  ;;  %p305_p7 = scmp.lt.s32.totalorder %s2466_s22, 3 }
  0x15   : > { %p2579_p6 = por %p298_p3, %p53_p0  ;;  %s2468_s27 = smov [#allocation8]  }
  0x16   : > { %s3150_s24 = scalar_select %p2574_p4, 1, 0 }
  0x17   : > { %s3151_s25 = scalar_select %p2579_p6, 1, 0 }
  0x18   : > { %p2584_p8 = pnand %p1746_p5, %p305_p7  ;;  %s317_s28 = sshll.u32 %s2468_s27, 4  ;;  %s318_s28 = int_to_ptr.vmem [resolvable:$true] %s317_s28 }
  0x19   : > { %s2469_s30 = smov [#allocation9]   ;;  %s2470_s13 = smov [#allocation11]  }
  0x1a   : > { %p2030_p9 = pneg %p2584_p8  ;;  %s333_s12 = sshll.u32 %s2469_s30, 4  ;;  %s334_s12 = int_to_ptr.vmem [resolvable:$true] %s333_s12 }
  0x1b   : > { %s349_s14 = sshll.u32 %s2470_s13, 4  ;;  %s2237_s15 = scalar_lea.vmem %s318_s28, 1024  ;;  %s350_s14 = int_to_ptr.vmem [resolvable:$true] %s349_s14 }
  0x1c   : > { %p2593_p11 = pnand %p2030_p9, %p3139_p1  ;;  %p2238_p13 = scmp.ne.s32.totalorder %s318_s28, %s2237_s15 }
  0x1d   : > { %p2245_p5 = scmp.lt.s32.totalorder %s318_s28, %s318_s28  ;;  %p2246_p7 = scmp.lt.s32.totalorder %s2237_s15, %s2237_s15 }
  0x1e   : > { %p2228_p12 = pneg %p2593_p11 }
  0x1f   : > { %p2247_p9 = por %p2246_p7, %p2245_p5 }
  0x20   : > { %p2240_p0 = pnand %p2238_p13, %p2228_p12 }
  0x22   : > { %p2241_p3 = pneg %p2240_p0 }
  0x24   : > { %p2248_p10 = pnand %p2247_p9, %p2241_p3 }
  0x26   : > { %2251 = shalt.err (!%p2248_p10)
}
  0x27   : > { %s2471_s16 = smov 64   ;;  %s2472_s17 = smov 4  }
  0x28   : > { %s3154_s2 = sld [smem:[#allocation24_spill]]  ;;  %s2263_s27 = scalar_lea.vmem %s334_s12, 1024 }
  0x29   : > { %p2264_p13 = scmp.ne.s32.totalorder %s334_s12, %s2263_s27  ;;  %p2271_p3 = scmp.lt.s32.totalorder %s334_s12, %s334_s12 }
  0x2a   : > { %p2272_p10 = scmp.lt.s32.totalorder %s2263_s27, %s2263_s27 }
  0x2b   : > { %p2266_p0 = pnand %p2264_p13, %p2228_p12 }
  0x2c   : > { %p2273_p7 = por %p2272_p10, %p2271_p3 }
  0x2d   : > { %p2267_p5 = pneg %p2266_p0 }
  0x2e   : > { %2033 = dma.hbm_to_vmem [thread:$0]  (!%p2593_p11), %s3154_s2, 1024, %s318_s28, [#allocation7], %s2471_s16, %s2471_s16, %s2472_s17  }
  0x2f   : > { %p2274_p9 = pnand %p2273_p7, %p2267_p5 }
  0x31   : > { %2277 = shalt.err (!%p2274_p9)
}
  0x32   : > { %s3155_s4 = sld [smem:[#allocation25_spill]]  ;;  %s2289_s28 = scalar_lea.vmem %s350_s14, 1024 }
  0x33   : > { %p2290_p1 = scmp.ne.s32.totalorder %s350_s14, %s2289_s28  ;;  %p2297_p3 = scmp.lt.s32.totalorder %s350_s14, %s350_s14 }
  0x34   : > { %p2298_p5 = scmp.lt.s32.totalorder %s2289_s28, %s2289_s28 }
  0x35   : > { %p2292_p13 = pnand %p2290_p1, %p2228_p12 }
  0x36   : > { %p2299_p10 = por %p2298_p5, %p2297_p3 }
  0x37   : > { %p2293_p0 = pneg %p2292_p13 }
  0x38   : > { %2036 = dma.hbm_to_vmem [thread:$0]  (!%p2593_p11), %s3155_s4, 1024, %s334_s12, [#allocation10], %s2471_s16, %s2471_s16, %s2472_s17  }
  0x39   : > { %p2300_p7 = pnand %p2299_p10, %p2293_p0 }
  0x3b   : > { %2303 = shalt.err (!%p2300_p7)
}
  0x3c   : > { %s3156_s6 = sld [smem:[#allocation26_spill]]  ;;  %s2473_s12 = smov [#allocation12]  }
  0x3d   : > { %s362_s23 = sshll.u32 %s2473_s12, 4  ;;  %s363_s23 = int_to_ptr.vmem [resolvable:$true] %s362_s23 }
  0x3e   : > { %s2315_s27 = scalar_lea.vmem %s363_s23, 1024  ;;  %p2323_p0 = scmp.lt.s32.totalorder %s363_s23, %s363_s23 }
  0x3f   : > { %p2316_p1 = scmp.ne.s32.totalorder %s363_s23, %s2315_s27  ;;  %p2324_p3 = scmp.lt.s32.totalorder %s2315_s27, %s2315_s27 }
  0x41   : > { %p2318_p9 = pnand %p2316_p1, %p2228_p12  ;;  %p2325_p5 = por %p2324_p3, %p2323_p0 }
  0x42   : > { %2039 = dma.hbm_to_vmem [thread:$0]  (!%p2593_p11), %s3156_s6, 1024, %s350_s14, [#allocation10], %s2471_s16, %s2471_s16, %s2472_s17  }
  0x43   : > { %p2319_p13 = pneg %p2318_p9 }
  0x45   : > { %p2326_p10 = pnand %p2325_p5, %p2319_p13 }
  0x47   : > { %2329 = shalt.err (!%p2326_p10)
}
  0x48   : > { %s3157_s7 = sld [smem:[#allocation27_spill]]  ;;  %s2644_s29 = sadd.s32 1, %s2466_s22  }
  0x49   : > { %s40_s13 = sadd.s32 1, %s2462_s21  ;;  %s37_s28 = ssub.s32 %s2466_s22, %s2644_s29 }
  0x4a   : > { %p47_p12 = scmp.ne.s32.totalorder %s2462_s21, %s2458_s20  ;;  %p38_p7 = scmp.eq.s32.totalorder %s37_s28, 0 }
  0x4b   : > { %p48_p1 = scmp.eq.s32.totalorder %s2466_s22, 0  ;;  %p2058_p13 = scmp.lt.s32.totalorder %s2466_s22, 2 }
  0x4c   : > { %p2654_p9 = por %p292_p2, %p47_p12  ;;  %s385_s12 = sand.u32 1, %s2462_s21  }
  0x4d   : > { %s2660_s18 = scalar_select %p38_p7, %s2462_s21, %s40_s13  }
  0x4e   : > { %2042 = dma.hbm_to_vmem [thread:$0]  (!%p2593_p11), %s3157_s7, 1024, %s363_s23, [#allocation13], %s2471_s16, %s2471_s16, %s2472_s17  }
  0x4f   : > { %s3158_s15 = scalar_select %p2654_p9, 1, 0 }
  0x50   : > { %3159 = sst [smem:[#allocation22_spill]] %s2660_s18  ;;  %p49_p0 = por %p48_p1, %p47_p12 }
  0x51   : > { %s2663_s27 = sshll.u32 %s385_s12, 7  ;;  %s3140_s16 = sshll.u32 %s2466_s22, 11 }
  0x52   : > { %s3160_s0 = sld [smem:[#allocation23_spill]]  ;;  %s389_s30 = scalar_lea.vmem [#allocation3], %s2663_s27 }
  0x53   : > { %s397_s28 = sshll.u32 %s389_s30, 4  ;;  %p2676_p2 = pnand %p2058_p13, %p49_p0  ;;  %s2674_s28 = int_to_ptr.vmem [resolvable:$true] %s397_s28 }
  0x54   : > { %s2680_s2 = scalar_lea.sflag [#allocation4], %s385_s12 }
  0x55   : > { %p2332_p3 = pneg %p2676_p2 }
  0x58   : > { %s2671_s14 = scalar_lea.hbm %s3160_s0, %s3140_s16  ;;  %s2335_s30 = scalar_lea.hbm %s3160_s0, 4096 }
  0x59   : > { %s2330_s4 = scalar_lea.hbm %s2671_s14, 2048  ;;  %p2336_p12 = scmp.lt.s32.totalorder %s2671_s14, %s3160_s0 }
  0x5a   : > { %p2331_p11 = scmp.ne.s32.totalorder %s2671_s14, %s2330_s4  ;;  %p2337_p7 = scmp.lt.s32.totalorder %s2335_s30, %s2330_s4 }
  0x5c   : > { %p2333_p5 = pnand %p2332_p3, %p2331_p11  ;;  %p2338_p1 = por %p2337_p7, %p2336_p12 }
  0x5e   : > { %p2334_p10 = pneg %p2333_p5 }
  0x60   : > { %p2339_p13 = pnand %p2338_p1, %p2334_p10 }
  0x62   : > { %2342 = shalt.err (!%p2339_p13)
}
  0x63   : > { %s2343_s12 = scalar_lea.vmem %s2674_s28, 2048  ;;  %s2474_s17 = smov [#allocation3]  }
  0x64   : > { %p2344_p0 = scmp.ne.s32.totalorder %s2674_s28, %s2343_s12  ;;  %s2348_s23 = sshll.u32 %s2474_s17, 4  ;;  %s2349_s23 = int_to_ptr.vmem [resolvable:$false] %s2348_s23 }
  0x65   : > { %s2350_s7 = scalar_lea.vmem %s2349_s23, 4096  ;;  %p2351_p6 = scmp.lt.s32.totalorder %s2674_s28, %s2349_s23 }
  0x66   : > { %p2346_p11 = pnand %p2344_p0, %p2332_p3  ;;  %p2352_p9 = scmp.lt.s32.totalorder %s2350_s7, %s2343_s12 }
  0x68   : > { %p2347_p5 = pneg %p2346_p11  ;;  %p2353_p4 = por %p2352_p9, %p2351_p6 }
  0x6a   : > { %p2354_p12 = pnand %p2353_p4, %p2347_p5 }
  0x6c   : > { %2357 = shalt.err (!%p2354_p12)
}
  0x6d   : > { %s2475_s4 = smov 128   ;;  %s2476_s6 = smov 8  }
  0x6e   : > { %2046 = dma.hbm_to_vmem [thread:$0]  (!%p2676_p2), %s2671_s14, 2048, %s2674_s28, %s2680_s2, %s2475_s4, %s2475_s4, %s2476_s6  }
  0x6f   : > { %s3162_s16 = sshll.u32 %s2466_s22, 11  ;;  %s411_s17 = scalar_lea.vmem [#allocation6], %s2663_s27 }
  0x70   : > { %s2715_s12 = scalar_lea.hbm %s3128_s1, %s3162_s16  ;;  %s419_s23 = sshll.u32 %s411_s17, 4  ;;  %s2718_s23 = int_to_ptr.vmem [resolvable:$true] %s419_s23 }
  0x71   : > { %s407_s0 = sand.u32 1, %s2466_s22   ;;  %s2358_s21 = scalar_lea.hbm %s2715_s12, 2048 }
  0x72   : > { %s408_s18 = scalar_lea.sflag [#allocation7], %s407_s0  ;;  %p2359_p4 = scmp.ne.s32.totalorder %s2715_s12, %s2358_s21 }
  0x73   : > { %s2363_s28 = scalar_lea.hbm %s3128_s1, 4096  ;;  %p2364_p10 = scmp.lt.s32.totalorder %s2715_s12, %s3128_s1 }
  0x74   : > { %p2361_p6 = pnand %p2359_p4, %p2332_p3  ;;  %p2365_p7 = scmp.lt.s32.totalorder %s2363_s28, %s2358_s21 }
  0x76   : > { %p2362_p9 = pneg %p2361_p6  ;;  %p2366_p1 = por %p2365_p7, %p2364_p10 }
  0x78   : > { %p2367_p13 = pnand %p2366_p1, %p2362_p9 }
  0x7a   : > { %2370 = shalt.err (!%p2367_p13)
}
  0x7b   : > { %s2371_s0 = scalar_lea.vmem %s2718_s23, 2048  ;;  %s2477_s27 = smov [#allocation6]  }
  0x7c   : > { %p2372_p0 = scmp.ne.s32.totalorder %s2718_s23, %s2371_s0  ;;  %s2376_s30 = sshll.u32 %s2477_s27, 4  ;;  %s2377_s30 = int_to_ptr.vmem [resolvable:$false] %s2376_s30 }
  0x7d   : > { %s2378_s17 = scalar_lea.vmem %s2377_s30, 4096  ;;  %p2379_p12 = scmp.lt.s32.totalorder %s2718_s23, %s2377_s30 }
  0x7e   : > { %p2374_p11 = pnand %p2372_p0, %p2332_p3  ;;  %p2380_p4 = scmp.lt.s32.totalorder %s2378_s17, %s2371_s0 }
  0x80   : > { %p2375_p5 = pneg %p2374_p11  ;;  %p2381_p6 = por %p2380_p4, %p2379_p12 }
  0x82   : > { %p2382_p10 = pnand %p2381_p6, %p2375_p5 }
  0x84   : > { %2385 = shalt.err (!%p2382_p10)
}
  0x85   : > { %2049 = dma.hbm_to_vmem [thread:$0]  (!%p2676_p2), %s2715_s12, 2048, %s2718_s23, %s408_s18, %s2475_s4, %s2475_s4, %s2476_s6  }
  0x86   : > { %431 = sbr.rel (%p2584_p8) target bundleno = 877 (0x36d), region = 64  ;;  %s2749_s21 = sand.u32 (!%p2584_p8), 1, %s2458_s20  }
  0x87   : > { %s2752_s2 = sshll.u32 (!%p2584_p8), %s2749_s21, 7  ;;  %s434_s14 = scalar_lea.sflag (!%p2584_p8), [#allocation4], %s2749_s21 }
  0x88   : > { %s2756_s13 = scalar_lea.vmem (!%p2584_p8), [#allocation3], %s2752_s2  ;;  %p3163_p3 = scmp.ne.s32.totalorder (!%p2584_p8), %s3150_s24, 0 }
  0x8b   : > { %2429 = dma.done.wait (%p3163_p3), %s434_s14, 2048  }
  0x8c   : > { %2431 = vsyncadd (%p3163_p3), %s434_s14, 4294965248  ;;  %s442_s26 = sand.u32 1, %s2565_s10   ;;  %s2764_s4 = scalar_lea.vmem [#allocation6], %s2752_s2 }
  0x8d   : > { %s443_s18 = scalar_lea.sflag [#allocation7], %s442_s26 }
  0x8e   : > { %2433 = dma.done.wait (%p3163_p3), %s443_s18, 2048  }
  0x8f   : > { %2435 = vsyncadd (%p3163_p3), %s443_s18, 4294965248  ;;  %p3164_p8 = scmp.eq.s32.totalorder %s2565_s10, 0 }
  0x91   : > { %2437 = dma.done.wait (%p3164_p8), [#allocation7], 1024   ;;  %p3165_p2 = pmov %p3164_p8 }
  0x93   : > { %2439 = vsyncadd (%p3165_p2), [#allocation7], 4294966272  ;;  %p3166_p9 = pmov %p3165_p2 }
  0x94   : > { %p3167_p7 = pmov %p3165_p2 }
  0x95   : > { %2441 = dma.done.wait (%p3166_p9), [#allocation10], 2048  }
  0x96   : > { %2443 = vsyncadd (%p3167_p7), [#allocation10], 4294965248  ;;  %p3168_p1 = pmov %p3165_p2 }
  0x98   : > { %2445 = dma.done.wait (%p3168_p1), [#allocation13], 1024   ;;  %p3169_p13 = pmov %p3168_p1 }
  0x99   : > { %v2106_v0 = vld [vmem:[#allocation8 + $0x38] sm:$0xff]   ;;  %v2108_v2 = vld [vmem:[#allocation8 + $0x30] sm:$0xff]   ;;  %v2110_v4 = vld [vmem:[#allocation8 + $0x28] sm:$0xff]   ;;  %s1406_s27 = sld [smem:[#allocation2]]  ;;  %s3035_s30 = scalar_lea.vmem [#allocation14], %s2752_s2 }
  0x9a   : > { %2447 = vsyncadd (%p3169_p13), [#allocation13], 4294966272  ;;  %v2107_v1 = vld [vmem:[#allocation9 + $0x38] sm:$0xff]   ;;  %1880 = vmatprep.subr.bf16.mxu0 %v2106_v0  ;;  %v2109_v3 = vld [vmem:[#allocation9 + $0x30] sm:$0xff]   ;;  %s1815_s17 = sshll.u32 %s2565_s10, 11  ;;  %s1611_s2 = sshll.u32 %s3035_s30, 4  ;;  %s3076_s2 = int_to_ptr.vmem [resolvable:$true] %s1611_s2 }
  0x9b   : > { %1912 = vmatprep.subr.bf16.mxu1 %v2107_v1  ;;  %1881 = vmatpush3.bf16.msra.mxu0 %v2106_v0  ;;  %v2111_v5 = vld [vmem:[#allocation9 + $0x28] sm:$0xff]   ;;  %v2112_v6 = vld [vmem:[#allocation8 + $0x20] sm:$0xff]   ;;  %v2114_v8 = vld [vmem:[#allocation8 + $0x18] sm:$0xff]   ;;  %s3074_s26 = scalar_lea.hbm %s3138_s11, %s1815_s17  ;;  %s1597_s10 = scalar_lea.sflag [#allocation5], %s2749_s21 }
  0x9c   : > { %1913 = vmatpush3.bf16.msra.mxu1 %v2107_v1  ;;  %1882 = vmatprep.subr.bf16.mxu0 %v2108_v2  ;;  %v2113_v7 = vld [vmem:[#allocation9 + $0x20] sm:$0xff]   ;;  %v2115_v9 = vld [vmem:[#allocation9 + $0x18] sm:$0xff]   ;;  %v2116_v10 = vld [vmem:[#allocation8 + $0x10] sm:$0xff]   ;;  %s2386_s18 = scalar_lea.vmem %s3076_s2, 2048  ;;  %p3170_p11 = scmp.ne.s32.totalorder %s3158_s15, 0 }
  0x9d   : > { %1914 = vmatprep.subr.bf16.mxu1 %v2109_v3  ;;  %v510_v11 = vld [vmem:[%s2756_s13] sm:$0xff]  ;;  %v511_v12 = vld [vmem:[%s2756_s13 + $0x8] sm:$0xff]  ;;  %v2117_v14 = vld [vmem:[#allocation9 + $0x10] sm:$0xff]   ;;  %p2387_p0 = scmp.ne.s32.totalorder %s3076_s2, %s2386_s18  ;;  %s2478_s24 = smov [#allocation14]  }
  0x9e   : > { %v534_v13 = vld [vmem:[%s2764_s4] sm:$0xff]  ;;  %v526_v15 = vpack.c.bf16 %v511_v12, %v510_v11  ;;  %v535_v16 = vld [vmem:[%s2764_s4 + $0x8] sm:$0xff]  ;;  %v512_v22 = vld [vmem:[%s2756_s13 + $0x10] sm:$0xff]  ;;  %s2390_s6 = sshll.u32 %s2478_s24, 4  ;;  %s2391_s6 = int_to_ptr.vmem [resolvable:$false] %s2390_s6 }
  0x9f   : > { %1883 = vmatpush3.bf16.msra.mxu0 %v2108_v2  ;;  %v550_v17 = vpack.c.bf16 %v535_v16, %v534_v13  ;;  %v2118_v18 = vld [vmem:[#allocation8 + $0x8] sm:$0xff]   ;;  %v2120_v20 = vld [vmem:[#allocation8] sm:$0xff]   ;;  %v513_v23 = vld [vmem:[%s2756_s13 + $0x18] sm:$0xff]  ;;  %p2388_p5 = pnand %p2387_p0, %p3170_p11  ;;  %s2392_s12 = scalar_lea.vmem %s2391_s6, 4096 }
  0xa0   : > { %1915 = vmatpush3.bf16.msra.mxu1 %v2109_v3  ;;  %1884 = vmatprep.subr.bf16.mxu0 %v2110_v4  ;;  %v2119_v19 = vld [vmem:[#allocation9 + $0x8] sm:$0xff]   ;;  %v2121_v21 = vld [vmem:[#allocation9] sm:$0xff]   ;;  %v536_v24 = vld [vmem:[%s2764_s4 + $0x10] sm:$0xff]  ;;  %v527_v32 = vpack.c.bf16 %v513_v23, %v512_v22  ;;  %p2393_p4 = scmp.lt.s32.totalorder %s3076_s2, %s2391_s6  ;;  %p2394_p6 = scmp.lt.s32.totalorder %s2392_s12, %s2386_s18 }
  0xa1   : > { %1916 = vmatprep.subr.bf16.mxu1 %v2111_v5  ;;  %1896 = vmatprep.mubr.bf16.mxu0 %v526_v15  ;;  %v537_v25 = vld [vmem:[%s2764_s4 + $0x18] sm:$0xff]  ;;  %v514_v26 = vld [vmem:[%s2756_s13 + $0x20] sm:$0xff]  ;;  %v515_v27 = vld [vmem:[%s2756_s13 + $0x28] sm:$0xff]  ;;  %p2389_p12 = pneg %p2388_p5 }
  0xa2   : > { %1928 = vmatprep.mubr.bf16.mxu1 %v550_v17  ;;  %v538_v28 = vld [vmem:[%s2764_s4 + $0x20] sm:$0xff]  ;;  %v539_v29 = vld [vmem:[%s2764_s4 + $0x28] sm:$0xff]  ;;  %v2123_v30 = vld [vmem:[#allocation12 + $0x38] sm:$0xff]   ;;  %v551_v33 = vpack.c.bf16 %v537_v25, %v536_v24  ;;  %v528_v34 = vpack.c.bf16 %v515_v27, %v514_v26  ;;  %p2395_p10 = por %p2394_p6, %p2393_p4 }
  0xa3   : > { %1885 = vmatpush3.bf16.msra.mxu0 %v2110_v4  ;;  %v2122_v31 = vld [vmem:[#allocation11 + $0x38] sm:$0xff]   ;;  %v552_v35 = vpack.c.bf16 %v539_v29, %v538_v28  ;;  %v516_v36 = vld [vmem:[%s2756_s13 + $0x30] sm:$0xff]  ;;  %v518_v41 = vld [vmem:[%s2756_s13 + $0x40] sm:$0xff] }
  0xa4   : > { %1917 = vmatpush3.bf16.msra.mxu1 %v2111_v5  ;;  %1886 = vmatprep.subr.bf16.mxu0 %v2112_v6  ;;  %v517_v37 = vld [vmem:[%s2756_s13 + $0x38] sm:$0xff]  ;;  %v2124_v38 = vld [vmem:[#allocation11 + $0x30] sm:$0xff]   ;;  %v519_v42 = vld [vmem:[%s2756_s13 + $0x48] sm:$0xff]  ;;  %p2396_p3 = pnand %p2395_p10, %p2389_p12 }
  0xa5   : > { %1918 = vmatprep.subr.bf16.mxu1 %v2113_v7  ;;  %v540_v39 = vld [vmem:[%s2764_s4 + $0x30] sm:$0xff]  ;;  %v541_v40 = vld [vmem:[%s2764_s4 + $0x38] sm:$0xff]  ;;  %v542_v44 = vld [vmem:[%s2764_s4 + $0x40] sm:$0xff]  ;;  %v529_v48 = vpack.c.bf16 %v517_v37, %v516_v36  ;;  %v530_v50 = vpack.c.bf16 %v519_v42, %v518_v41 }
  0xa6   : > { %v2125_v43 = vld [vmem:[#allocation12 + $0x30] sm:$0xff]   ;;  %v543_v45 = vld [vmem:[%s2764_s4 + $0x48] sm:$0xff]  ;;  %v553_v49 = vpack.c.bf16 %v541_v40, %v540_v39  ;;  %v2128_v52 = vld [vmem:[#allocation11 + $0x20] sm:$0xff]  }
  0xa7   : > { %1887 = vmatpush3.bf16.msra.mxu0 %v2112_v6  ;;  %v2126_v46 = vld [vmem:[#allocation11 + $0x28] sm:$0xff]   ;;  %v554_v51 = vpack.c.bf16 %v543_v45, %v542_v44  ;;  %v2129_v53 = vld [vmem:[#allocation12 + $0x20] sm:$0xff]   ;;  %v520_v54 = vld [vmem:[%s2756_s13 + $0x50] sm:$0xff] }
  0xa8   : > { %1919 = vmatpush3.bf16.msra.mxu1 %v2113_v7  ;;  %1888 = vmatprep.subr.bf16.mxu0 %v2114_v8  ;;  %v2127_v47 = vld [vmem:[#allocation12 + $0x28] sm:$0xff]   ;;  %v521_v55 = vld [vmem:[%s2756_s13 + $0x58] sm:$0xff]  ;;  %v544_v56 = vld [vmem:[%s2764_s4 + $0x50] sm:$0xff] }
  0xa9   : > { %1920 = vmatprep.subr.bf16.mxu1 %v2115_v9  ;;  %v545_v57 = vld [vmem:[%s2764_s4 + $0x58] sm:$0xff]  ;;  %v522_v58 = vld [vmem:[%s2756_s13 + $0x60] sm:$0xff]  ;;  %v523_v59 = vld [vmem:[%s2756_s13 + $0x68] sm:$0xff]  ;;  %v531_v63 = vpack.c.bf16 %v521_v55, %v520_v54 }
  0xaa   : > { %v546_v60 = vld [vmem:[%s2764_s4 + $0x60] sm:$0xff]  ;;  %v547_v61 = vld [vmem:[%s2764_s4 + $0x68] sm:$0xff]  ;;  %v2130_v62 = vld [vmem:[#allocation11 + $0x18] sm:$0xff]   ;;  %v555_v1 = vpack.c.bf16 %v545_v57, %v544_v56  ;;  %v532_v2 = vpack.c.bf16 %v523_v59, %v522_v58 }
  0xab   : > { %1889 = vmatpush3.bf16.msra.mxu0 %v2114_v8  ;;  %v2131_v0 = vld [vmem:[#allocation12 + $0x18] sm:$0xff]   ;;  %v556_v3 = vpack.c.bf16 %v547_v61, %v546_v60  ;;  %v524_v4 = vld [vmem:[%s2756_s13 + $0x70] sm:$0xff]  ;;  %v2134_v12 = vld [vmem:[#allocation11 + $0x8] sm:$0xff]  }
  0xac   : > { %1921 = vmatpush3.bf16.msra.mxu1 %v2115_v9  ;;  %1890 = vmatprep.subr.bf16.mxu0 %v2116_v10  ;;  %v525_v5 = vld [vmem:[%s2756_s13 + $0x78] sm:$0xff]  ;;  %v548_v6 = vld [vmem:[%s2764_s4 + $0x70] sm:$0xff]  ;;  %v2135_v13 = vld [vmem:[#allocation12 + $0x8] sm:$0xff]  }
  0xad   : > { %1922 = vmatprep.subr.bf16.mxu1 %v2117_v14  ;;  %v549_v7 = vld [vmem:[%s2764_s4 + $0x78] sm:$0xff]  ;;  %v533_v8 = vpack.c.bf16 %v525_v5, %v524_v4  ;;  %v2133_v11 = vld [vmem:[#allocation12 + $0x10] sm:$0xff]   ;;  %v2137_v15 = vld [vmem:[#allocation12] sm:$0xff]  }
  0xae   : > { %v557_v9 = vpack.c.bf16 %v549_v7, %v548_v6 }
  0xaf   : > { %1891 = vmatpush3.bf16.msra.mxu0 %v2116_v10  ;;  %v2132_v10 = vld [vmem:[#allocation11 + $0x10] sm:$0xff]  }
  0xb0   : > { %1923 = vmatpush3.bf16.msra.mxu1 %v2117_v14  ;;  %1892 = vmatprep.subr.bf16.mxu0 %v2118_v18  ;;  %v2136_v14 = vld [vmem:[#allocation11] sm:$0xff]  }
  0xb1   : > { %1924 = vmatprep.subr.bf16.mxu1 %v2119_v19 }
  0xb3   : > { %1893 = vmatpush3.bf16.msra.mxu0 %v2118_v18 }
  0xb4   : > { %1925 = vmatpush3.bf16.msra.mxu1 %v2119_v19  ;;  %1894 = vmatprep.subr.bf16.mxu0 %v2120_v20 }
  0xb5   : > { %1926 = vmatprep.subr.bf16.mxu1 %v2121_v21 }
  0xb7   : > { %1895 = vmatpush3.bf16.msra.mxu0 %v2120_v20  ;;  %v2817_v20 = vld [vmem:[%s3130_s3] ss:$0 sm:$0xff] }
  0xb8   : > { %1927 = vmatpush3.bf16.msra.mxu1 %v2121_v21  ;;  %1944 = vmatprep.subr.bf16.mxu0 %v2123_v30  ;;  %v2822_v21 = vld [vmem:[%s3132_s5] ss:$0 sm:$0xff] }
  0xb9   : > { %1976 = vmatprep.subr.bf16.mxu1 %v2122_v31 }
  0xba   : > { %1897 = vmatmul.mubr.bf16.vlgmr.msra.gmra.mxu0 %v527_v32 }
  0xbb   : > { %1929 = vmatmul.mubr.bf16.vlgmr.msra.gmra.mxu1 %v551_v33  ;;  %1900 = vmatprep.mubr.bf16.mxu0 %v528_v34 }
  0xbc   : > { %1932 = vmatprep.mubr.bf16.mxu1 %v552_v35  ;;  %1977 = vmatpush3.bf16.msra.mxu1 %v2122_v31 }
  0xbd   : > { %1945 = vmatpush3.bf16.msra.mxu0 %v2123_v30  ;;  %1978 = vmatprep.subr.bf16.mxu1 %v2124_v38 }
  0xbe   : > { %1946 = vmatprep.subr.bf16.mxu0 %v2125_v43 }
  0xc0   : > { %1979 = vmatpush3.bf16.msra.mxu1 %v2124_v38 }
  0xc1   : > { %1947 = vmatpush3.bf16.msra.mxu0 %v2125_v43  ;;  %1980 = vmatprep.subr.bf16.mxu1 %v2126_v46 }
  0xc2   : > { %1901 = vmatmul.mubr.bf16.gmra.mxu0 %v529_v48  ;;  %1948 = vmatprep.subr.bf16.mxu0 %v2127_v47 }
  0xc3   : > { %1933 = vmatmul.mubr.bf16.gmra.mxu1 %v553_v49  ;;  %1904 = vmatprep.mubr.bf16.mxu0 %v530_v50 }
  0xc4   : > { %1936 = vmatprep.mubr.bf16.mxu1 %v554_v51  ;;  %1981 = vmatpush3.bf16.msra.mxu1 %v2126_v46 }
  0xc5   : > { %1949 = vmatpush3.bf16.msra.mxu0 %v2127_v47  ;;  %1982 = vmatprep.subr.bf16.mxu1 %v2128_v52 }
  0xc6   : > { %1950 = vmatprep.subr.bf16.mxu0 %v2129_v53 }
  0xc8   : > { %1983 = vmatpush3.bf16.msra.mxu1 %v2128_v52 }
  0xc9   : > { %1951 = vmatpush3.bf16.msra.mxu0 %v2129_v53  ;;  %1984 = vmatprep.subr.bf16.mxu1 %v2130_v62 }
  0xca   : > { %1905 = vmatmul.mubr.bf16.gmra.mxu0 %v531_v63  ;;  %1952 = vmatprep.subr.bf16.mxu0 %v2131_v0 }
  0xcb   : > { %1937 = vmatmul.mubr.bf16.gmra.mxu1 %v555_v1  ;;  %1908 = vmatprep.mubr.bf16.mxu0 %v532_v2 }
  0xcc   : > { %1940 = vmatprep.mubr.bf16.mxu1 %v556_v3  ;;  %1985 = vmatpush3.bf16.msra.mxu1 %v2130_v62 }
  0xcd   : > { %1953 = vmatpush3.bf16.msra.mxu0 %v2131_v0  ;;  %1986 = vmatprep.subr.bf16.mxu1 %v2132_v10 }
  0xce   : > { %1954 = vmatprep.subr.bf16.mxu0 %v2133_v11 }
  0xd0   : > { %1987 = vmatpush3.bf16.msra.mxu1 %v2132_v10 }
  0xd1   : > { %1955 = vmatpush3.bf16.msra.mxu0 %v2133_v11  ;;  %1988 = vmatprep.subr.bf16.mxu1 %v2134_v12 }
  0xd2   : > { %1909 = vmatmul.mubr.bf16.gmra.mxu0 %v533_v8  ;;  %1956 = vmatprep.subr.bf16.mxu0 %v2135_v13 }
  0xd3   : > { %1941 = vmatmul.mubr.bf16.gmra.mxu1 %v557_v9 }
  0xd4   : > { %1989 = vmatpush3.bf16.msra.mxu1 %v2134_v12 }
  0xd5   : > { %1957 = vmatpush3.bf16.msra.mxu0 %v2135_v13  ;;  %1990 = vmatprep.subr.bf16.mxu1 %v2136_v14 }
  0xd6   : > { %1958 = vmatprep.subr.bf16.mxu0 %v2137_v15 }
  0xd8   : > { %1991 = vmatpush3.bf16.msra.mxu1 %v2136_v14 }
  0xd9   : > { %1959 = vmatpush3.bf16.msra.mxu0 %v2137_v15 }
 0x17a   : > { %v1898_v16 = vpop.f32.mrf.mxu0 }
 0x17b   : > { %v1930_v17 = vpop.f32.mrf.mxu1  ;;  %v672_v29 = vadd.f32 %v1898_v16, %v2817_v20 }
 0x17c   : > { %v663_v18 = vpop.f32.mrf.mxu0  ;;  %v840_v30 = vadd.f32 %v1930_v17, %v2822_v21 }
 0x17d   : > { %v831_v19 = vpop.f32.mrf.mxu1  ;;  %v664_v25 = vadd.f32 %v2817_v20, %v663_v18 }
 0x17e   : > { %v1899_v22 = vpop.f32.mrf.mxu0  ;;  %v832_v26 = vadd.f32 %v2822_v21, %v831_v19  ;;  %v920_v41 = vmul.f32 %v840_v30, %v672_v29 }
 0x17f   : > { %v675_v23 = vadd.f32 %v1899_v22, %v2817_v20  ;;  %v1931_v24 = vpop.f32.mrf.mxu1 }
 0x180   : > { %v843_v27 = vadd.f32 %v1931_v24, %v2822_v21  ;;  %v666_v28 = vpop.f32.mrf.mxu0  ;;  %v918_v37 = vmul.f32 %v832_v26, %v664_v25 }
 0x181   : > { %v667_v31 = vadd.f32 %v2817_v20, %v666_v28  ;;  %v834_v32 = vpop.f32.mrf.mxu1 }
 0x182   : > { %v835_v33 = vadd.f32 %v2822_v21, %v834_v32  ;;  %v1902_v34 = vpop.f32.mrf.mxu0  ;;  %v921_v35 = vmul.f32 %v843_v27, %v675_v23  ;;  %v895_v42 = vpack.c.bf16 %v843_v27, %v840_v30 }
 0x183   : > { %v1934_v36 = vpop.f32.mrf.mxu1  ;;  %v688_v53 = vadd.f32 %v1902_v34, %v2817_v20 }
 0x184   : > { %v894_v38 = vpack.c.bf16 %v835_v33, %v832_v26  ;;  %v919_v39 = vmul.f32 %v835_v33, %v667_v31  ;;  %v679_v40 = vpop.f32.mrf.mxu0  ;;  %v935_v46 = vpack.c.bf16 %v921_v35, %v920_v41  ;;  %v856_v54 = vadd.f32 %v1934_v36, %v2822_v21 }
 0x185   : > { %v847_v43 = vpop.f32.mrf.mxu1  ;;  %v680_v49 = vadd.f32 %v2817_v20, %v679_v40 }
 0x186   : > { %1992 = vmatprep.mubr.bf16.mxu1 %v894_v38  ;;  %v1903_v44 = vpop.f32.mrf.mxu0  ;;  %v934_v45 = vpack.c.bf16 %v919_v39, %v918_v37  ;;  %v848_v50 = vadd.f32 %v2822_v21, %v847_v43  ;;  %v924_v1 = vmul.f32 %v856_v54, %v688_v53 }
 0x187   : > { %v691_v47 = vadd.f32 %v1903_v44, %v2817_v20  ;;  %v1935_v48 = vpop.f32.mrf.mxu1  ;;  %1993 = vmatmul.mubr.bf16.vlgmr.msra.gmra.mxu1 %v895_v42 }
 0x188   : > { %v859_v51 = vadd.f32 %v1935_v48, %v2822_v21  ;;  %1960 = vmatprep.mubr.bf16.mxu0 %v934_v45  ;;  %v682_v52 = vpop.f32.mrf.mxu0  ;;  %v922_v61 = vmul.f32 %v848_v50, %v680_v49 }
 0x189   : > { %v683_v55 = vadd.f32 %v2817_v20, %v682_v52  ;;  %v850_v56 = vpop.f32.mrf.mxu1  ;;  %1961 = vmatmul.mubr.bf16.vlgmr.msra.gmra.mxu0 %v935_v46 }
 0x18a   : > { %v851_v57 = vadd.f32 %v2822_v21, %v850_v56  ;;  %v1906_v58 = vpop.f32.mrf.mxu0  ;;  %v925_v59 = vmul.f32 %v859_v51, %v691_v47  ;;  %v897_v2 = vpack.c.bf16 %v859_v51, %v856_v54 }
 0x18b   : > { %v1938_v60 = vpop.f32.mrf.mxu1  ;;  %v704_v13 = vadd.f32 %v1906_v58, %v2817_v20 }
 0x18c   : > { %v896_v62 = vpack.c.bf16 %v851_v57, %v848_v50  ;;  %v923_v63 = vmul.f32 %v851_v57, %v683_v55  ;;  %v695_v0 = vpop.f32.mrf.mxu0  ;;  %v937_v8 = vpack.c.bf16 %v925_v59, %v924_v1  ;;  %v872_v14 = vadd.f32 %v1938_v60, %v2822_v21 }
 0x18d   : > { %v863_v3 = vpop.f32.mrf.mxu1  ;;  %v696_v9 = vadd.f32 %v2817_v20, %v695_v0 }
 0x18e   : > { %1996 = vmatprep.mubr.bf16.mxu1 %v896_v62  ;;  %v1907_v4 = vpop.f32.mrf.mxu0  ;;  %v936_v5 = vpack.c.bf16 %v923_v63, %v922_v61  ;;  %v864_v10 = vadd.f32 %v2822_v21, %v863_v3  ;;  %v928_v27 = vmul.f32 %v872_v14, %v704_v13 }
 0x18f   : > { %v707_v6 = vadd.f32 %v1907_v4, %v2817_v20  ;;  %v1939_v7 = vpop.f32.mrf.mxu1  ;;  %1997 = vmatmul.mubr.bf16.gmra.mxu1 %v897_v2 }
 0x190   : > { %v875_v11 = vadd.f32 %v1939_v7, %v2822_v21  ;;  %1964 = vmatprep.mubr.bf16.mxu0 %v936_v5  ;;  %v698_v12 = vpop.f32.mrf.mxu0  ;;  %v926_v23 = vmul.f32 %v864_v10, %v696_v9 }
 0x191   : > { %v699_v15 = vadd.f32 %v2817_v20, %v698_v12  ;;  %v866_v16 = vpop.f32.mrf.mxu1  ;;  %1965 = vmatmul.mubr.bf16.gmra.mxu0 %v937_v8 }
 0x192   : > { %v867_v17 = vadd.f32 %v2822_v21, %v866_v16  ;;  %v1910_v18 = vpop.f32.mrf.mxu0  ;;  %v929_v19 = vmul.f32 %v875_v11, %v707_v6  ;;  %v899_v28 = vpack.c.bf16 %v875_v11, %v872_v14 }
 0x193   : > { %v1942_v22 = vpop.f32.mrf.mxu1  ;;  %v720_v39 = vadd.f32 %v1910_v18, %v2817_v20 }
 0x194   : > { %v898_v24 = vpack.c.bf16 %v867_v17, %v864_v10  ;;  %v927_v25 = vmul.f32 %v867_v17, %v699_v15  ;;  %v711_v26 = vpop.f32.mrf.mxu0  ;;  %v939_v34 = vpack.c.bf16 %v929_v19, %v928_v27  ;;  %v888_v40 = vadd.f32 %v1942_v22, %v2822_v21 }
 0x195   : > { %v879_v29 = vpop.f32.mrf.mxu1  ;;  %v712_v35 = vadd.f32 %v2817_v20, %v711_v26 }
 0x196   : > { %2000 = vmatprep.mubr.bf16.mxu1 %v898_v24  ;;  %v1911_v30 = vpop.f32.mrf.mxu0  ;;  %v938_v31 = vpack.c.bf16 %v927_v25, %v926_v23  ;;  %v880_v36 = vadd.f32 %v2822_v21, %v879_v29  ;;  %v932_v48 = vmul.f32 %v888_v40, %v720_v39 }
 0x197   : > { %v723_v32 = vadd.f32 %v1911_v30, %v2817_v20  ;;  %v1943_v33 = vpop.f32.mrf.mxu1  ;;  %2001 = vmatmul.mubr.bf16.gmra.mxu1 %v899_v28 }
 0x198   : > { %v891_v37 = vadd.f32 %v1943_v33, %v2822_v21  ;;  %1968 = vmatprep.mubr.bf16.mxu0 %v938_v31  ;;  %v714_v38 = vpop.f32.mrf.mxu0  ;;  %v930_v45 = vmul.f32 %v880_v36, %v712_v35 }
 0x199   : > { %v715_v41 = vadd.f32 %v2817_v20, %v714_v38  ;;  %v882_v42 = vpop.f32.mrf.mxu1  ;;  %1969 = vmatmul.mubr.bf16.gmra.mxu0 %v939_v34  ;;  %v2859_v20 = vld [vmem:[%s3135_s8] ss:$0 sm:$0xff] }
 0x19a   : > { %v883_v43 = vadd.f32 %v2822_v21, %v882_v42  ;;  %v933_v44 = vmul.f32 %v891_v37, %v723_v32  ;;  %v901_v49 = vpack.c.bf16 %v891_v37, %v888_v40 }
 0x19c   : > { %v900_v46 = vpack.c.bf16 %v883_v43, %v880_v36  ;;  %v931_v47 = vmul.f32 %v883_v43, %v715_v41  ;;  %v941_v51 = vpack.c.bf16 %v933_v44, %v932_v48 }
 0x19e   : > { %2004 = vmatprep.mubr.bf16.mxu1 %v900_v46  ;;  %v940_v50 = vpack.c.bf16 %v931_v47, %v930_v45 }
 0x19f   : > { %2005 = vmatmul.mubr.bf16.gmra.mxu1 %v901_v49 }
 0x1a0   : > { %1972 = vmatprep.mubr.bf16.mxu0 %v940_v50  ;;  %v2901_v50 = vld [vmem:[%s3136_s9] ss:$0 sm:$0xff] }
 0x1a1   : > { %1973 = vmatmul.mubr.bf16.gmra.mxu0 %v941_v51 }
 0x247   : > { %v1994_v52 = vpop.f32.mrf.mxu1 }
 0x249   : > { %v1962_v53 = vpop.f32.mrf.mxu0  ;;  %v1185_v21 = vpop.f32.mrf.mxu1 }
 0x24a   : > { %v1194_v54 = vadd.f32 %v1994_v52, %v1962_v53 }
 0x24b   : > { %v1040_v55 = vpop.f32.mrf.mxu0  ;;  %v1995_v56 = vpop.f32.mrf.mxu1 }
 0x24c   : > { %v1257_v57 = vadd.f32 %v2859_v20, %v1194_v54  ;;  %v1186_v58 = vadd.f32 %v1185_v21, %v1040_v55 }
 0x24d   : > { %v1963_v59 = vpop.f32.mrf.mxu0  ;;  %v1188_v60 = vpop.f32.mrf.mxu1 }
 0x24e   : > { %v1289_v61 = vmul.f32 0.70710677, %v1257_v57  ;;  %v1255_v62 = vadd.f32 %v2859_v20, %v1186_v58  ;;  %v1197_v63 = vadd.f32 %v1995_v56, %v1963_v59  ;;  %v1273_v46 = vmul.f32 0.5, %v1257_v57 }
 0x24f   : > { %v1043_v0 = vpop.f32.mrf.mxu0  ;;  %v1998_v1 = vpop.f32.mrf.mxu1 }
 0x250   : > { %2138 = verf.f32 %v1289_v61  ;;  %v1287_v2 = vmul.f32 0.70710677, %v1255_v62  ;;  %v2864_v3 = vadd.f32 %v2859_v20, %v1197_v63  ;;  %v1189_v4 = vadd.f32 %v1188_v60, %v1043_v0 }
 0x251   : > { %v1966_v5 = vpop.f32.mrf.mxu0  ;;  %v1201_v6 = vpop.f32.mrf.mxu1  ;;  %v1271_v52 = vmul.f32 0.5, %v1255_v62 }
 0x252   : > { %2140 = verf.f32 %v1287_v2  ;;  %v1290_v7 = vmul.f32 0.70710677, %v2864_v3  ;;  %v1210_v8 = vadd.f32 %v1998_v1, %v1966_v5  ;;  %v2868_v9 = vadd.f32 %v2859_v20, %v1189_v4 }
 0x253   : > { %v1056_v10 = vpop.f32.mrf.mxu0  ;;  %v1999_v11 = vpop.f32.mrf.mxu1  ;;  %v1274_v62 = vmul.f32 0.5, %v2864_v3 }
 0x254   : > { %2142 = verf.f32 %v1290_v7  ;;  %v2871_v12 = vadd.f32 %v2859_v20, %v1210_v8  ;;  %v1202_v13 = vadd.f32 %v1201_v6, %v1056_v10  ;;  %v1288_v14 = vmul.f32 0.70710677, %v2868_v9 }
 0x255   : > { %v1967_v15 = vpop.f32.mrf.mxu0  ;;  %v1204_v16 = vpop.f32.mrf.mxu1 }
 0x256   : > { %v1293_v17 = vmul.f32 0.70710677, %v2871_v12  ;;  %v2876_v18 = vadd.f32 %v2859_v20, %v1202_v13  ;;  %v1213_v19 = vadd.f32 %v1999_v11, %v1967_v15  ;;  %2144 = verf.f32 %v1288_v14 }
 0x257   : > { %v1059_v22 = vpop.f32.mrf.mxu0  ;;  %v2002_v23 = vpop.f32.mrf.mxu1  ;;  %v1277_v10 = vmul.f32 0.5, %v2871_v12 }
 0x258   : > { %2146 = verf.f32 %v1293_v17  ;;  %v1291_v24 = vmul.f32 0.70710677, %v2876_v18  ;;  %v2880_v25 = vadd.f32 %v2859_v20, %v1213_v19  ;;  %v1205_v26 = vadd.f32 %v1204_v16, %v1059_v22 }
 0x259   : > { %v1970_v27 = vpop.f32.mrf.mxu0  ;;  %v1217_v28 = vpop.f32.mrf.mxu1 }
 0x25a   : > { %2148 = verf.f32 %v1291_v24  ;;  %v1294_v29 = vmul.f32 0.70710677, %v2880_v25  ;;  %v1226_v30 = vadd.f32 %v2002_v23, %v1970_v27  ;;  %v2884_v31 = vadd.f32 %v2859_v20, %v1205_v26 }
 0x25b   : > { %v1072_v32 = vpop.f32.mrf.mxu0  ;;  %v2003_v33 = vpop.f32.mrf.mxu1  ;;  %v1272_v23 = vmul.f32 0.5, %v2868_v9 }
 0x25c   : > { %2150 = verf.f32 %v1294_v29  ;;  %v2887_v34 = vadd.f32 %v2859_v20, %v1226_v30  ;;  %v1218_v35 = vadd.f32 %v1217_v28, %v1072_v32  ;;  %v1292_v37 = vmul.f32 0.70710677, %v2884_v31 }
 0x25d   : > { %v2139_v36 = vpop.eup %2138  ;;  %v1971_v38 = vpop.f32.mrf.mxu0  ;;  %v1275_v28 = vmul.f32 0.5, %v2876_v18  ;;  %v1278_v18 = vmul.f32 0.5, %v2880_v25 }
 0x25e   : > { %v1220_v39 = vpop.f32.mrf.mxu1  ;;  %v1297_v40 = vmul.f32 0.70710677, %v2887_v34  ;;  %v2892_v41 = vadd.f32 %v2859_v20, %v1218_v35  ;;  %v1229_v42 = vadd.f32 %v2003_v33, %v1971_v38  ;;  %2152 = verf.f32 %v1292_v37 }
 0x25f   : > { %v2141_v43 = vpop.eup %2140  ;;  %v1075_v44 = vpop.f32.mrf.mxu0  ;;  %v1321_v47 = vadd.f32 1.0, %v2139_v36 }
 0x260   : > { %v2006_v45 = vpop.f32.mrf.mxu1  ;;  %2154 = verf.f32 %v1297_v40  ;;  %v1295_v48 = vmul.f32 0.70710677, %v2892_v41  ;;  %v2896_v49 = vadd.f32 %v2859_v20, %v1229_v42  ;;  %v1221_v53 = vadd.f32 %v1220_v39, %v1075_v44 }
 0x261   : > { %v2143_v51 = vpop.eup %2142  ;;  %v1974_v21 = vpop.f32.mrf.mxu0  ;;  %v1337_v55 = vmul.f32 %v1321_v47, %v1273_v46  ;;  %v1319_v56 = vadd.f32 1.0, %v2141_v43  ;;  %v1281_v44 = vmul.f32 0.5, %v2887_v34  ;;  %v1279_v25 = vmul.f32 0.5, %v2892_v41 }
 0x262   : > { %v1233_v54 = vpop.f32.mrf.mxu1  ;;  %2156 = verf.f32 %v1295_v48  ;;  %v1298_v57 = vmul.f32 0.70710677, %v2896_v49  ;;  %v1242_v58 = vadd.f32 %v2006_v45, %v1974_v21  ;;  %v2905_v59 = vadd.f32 %v2859_v20, %v1221_v53 }
 0x263   : > { %v1088_v60 = vpop.f32.mrf.mxu0  ;;  %v1360_v61 = vmul.f32 %v2901_v50, %v1337_v55  ;;  %v1335_v63 = vmul.f32 %v1319_v56, %v1271_v52  ;;  %v1322_v0 = vadd.f32 1.0, %v2143_v51  ;;  %v2145_v1 = vpop.eup %2144  ;;  %v1276_v21 = vmul.f32 0.5, %v2884_v31 }
 0x264   : > { %v2910_v2 = vadd.f32 %v2859_v20, %v1242_v58  ;;  %v1234_v4 = vadd.f32 %v1233_v54, %v1088_v60  ;;  %v2007_v5 = vpop.f32.mrf.mxu1  ;;  %2158 = verf.f32 %v1298_v57  ;;  %v1296_v7 = vmul.f32 0.70710677, %v2905_v59 }
 0x265   : > { %v2147_v6 = vpop.eup %2146  ;;  %1378 = vadd.xlane.f32.xlu0 %v1360_v61  ;;  %v1975_v8 = vpop.f32.mrf.mxu0  ;;  %v1338_v3 = vmul.f32 %v1322_v0, %v1274_v62  ;;  %v1358_v17 = vmul.f32 %v2901_v50, %v1335_v63  ;;  %v1320_v22 = vadd.f32 1.0, %v2145_v1  ;;  %v1280_v61 = vmul.f32 0.5, %v2905_v59 }
 0x266   : > { %v1301_v11 = vmul.f32 0.70710677, %v2910_v2  ;;  %v2916_v13 = vadd.f32 %v2859_v20, %v1234_v4  ;;  %v1245_v14 = vadd.f32 %v2007_v5, %v1975_v8  ;;  %2160 = verf.f32 %v1296_v7  ;;  %v1236_v26 = vpop.f32.mrf.mxu1 }
 0x267   : > { %v2149_v15 = vpop.eup %2148  ;;  %v1091_v16 = vpop.f32.mrf.mxu0  ;;  %v1325_v19 = vadd.f32 1.0, %v2147_v6  ;;  %v1361_v35 = vmul.f32 %v2901_v50, %v1338_v3  ;;  %v1336_v9 = vmul.f32 %v1320_v22, %v1272_v23  ;;  %v1285_v7 = vmul.f32 0.5, %v2910_v2 }
 0x268   : > { %2162 = verf.f32 %v1301_v11  ;;  %v1299_v24 = vmul.f32 0.70710677, %v2916_v13  ;;  %v2922_v12 = vadd.f32 %v2859_v20, %v1245_v14  ;;  %v1237_v29 = vadd.f32 %v1236_v26, %v1091_v16 }
 0x269   : > { %v2151_v27 = vpop.eup %2150  ;;  %1374 = vadd.xlane.f32.xlu0 %v1358_v17  ;;  %v1341_v30 = vmul.f32 %v1325_v19, %v1277_v10  ;;  %v1323_v32 = vadd.f32 1.0, %v2149_v15  ;;  %v1359_v45 = vmul.f32 %v2901_v50, %v1336_v9  ;;  %v1283_v4 = vmul.f32 0.5, %v2916_v13 }
 0x26a   : > { %2164 = verf.f32 %v1299_v24  ;;  %v1302_v33 = vmul.f32 0.70710677, %v2922_v12  ;;  %v1268_v36 = vadd.f32 %v2859_v20, %v1237_v29  ;;  %v1326_v39 = vadd.f32 1.0, %v2151_v27 }
 0x26b   : > { %v1364_v37 = vmul.f32 %v2901_v50, %v1341_v30  ;;  %v1339_v38 = vmul.f32 %v1323_v32, %v1275_v28  ;;  %v2153_v40 = vpop.eup %2152  ;;  %v1282_v59 = vmul.f32 0.5, %v2896_v49  ;;  %v1286_v49 = vmul.f32 0.5, %v2922_v12 }
 0x26c   : > { %v1300_v43 = vmul.f32 0.70710677, %v1268_v36  ;;  %2166 = verf.f32 %v1302_v33  ;;  %v1342_v48 = vmul.f32 %v1326_v39, %v1278_v18  ;;  %v1324_v51 = vadd.f32 1.0, %v2153_v40 }
 0x26d   : > { %v2155_v42 = vpop.eup %2154  ;;  %1380 = vadd.xlane.f32.xlu0 %v1361_v35  ;;  %1386 = vadd.xlane.f32.xlu1 %v1364_v37  ;;  %v1362_v20 = vmul.f32 %v2901_v50, %v1339_v38  ;;  %v1284_v17 = vmul.f32 0.5, %v1268_v36  ;;  %v1407_v33 = vstv %s1406_s27 }
 0x26e   : > { %v1329_v46 = vadd.f32 1.0, %v2155_v42  ;;  %2168 = verf.f32 %v1300_v43  ;;  %v1365_v55 = vmul.f32 %v2901_v50, %v1342_v48  ;;  %v1340_v56 = vmul.f32 %v1324_v51, %v1276_v21 }
 0x26f   : > { %v2157_v47 = vpop.eup %2156 }
 0x270   : > { %v1345_v52 = vmul.f32 %v1329_v46, %v1281_v44  ;;  %v1327_v53 = vadd.f32 1.0, %v2157_v47  ;;  %v1363_v31 = vmul.f32 %v2901_v50, %v1340_v56 }
 0x271   : > { %1376 = vadd.xlane.f32.xlu0 %v1359_v45  ;;  %1382 = vadd.xlane.f32.xlu1 %v1362_v20  ;;  %v2159_v54 = vpop.eup %2158 }
 0x272   : > { %v1368_v34 = vmul.f32 %v2901_v50, %v1345_v52  ;;  %v1343_v57 = vmul.f32 %v1327_v53, %v1279_v25  ;;  %v1330_v6 = vadd.f32 1.0, %v2159_v54 }
 0x273   : > { %v2161_v58 = vpop.eup %2160 }
 0x274   : > { %v1328_v63 = vadd.f32 1.0, %v2161_v58  ;;  %v1366_v41 = vmul.f32 %v2901_v50, %v1343_v57  ;;  %v1346_v16 = vmul.f32 %v1330_v6, %v1282_v59 }
 0x275   : > { %v2163_v60 = vpop.eup %2162  ;;  %1388 = vadd.xlane.f32.xlu1 %v1365_v55  ;;  %1394 = vadd.xlane.f32.xlu0 %v1368_v34 }
 0x276   : > { %v1344_v1 = vmul.f32 %v1328_v63, %v1280_v61  ;;  %v1333_v62 = vadd.f32 1.0, %v2163_v60  ;;  %v1369_v23 = vmul.f32 %v2901_v50, %v1346_v16 }
 0x277   : > { %v2165_v0 = vpop.eup %2164 }
 0x278   : > { %v1331_v5 = vadd.f32 1.0, %v2165_v0  ;;  %v1367_v11 = vmul.f32 %v2901_v50, %v1344_v1  ;;  %v1349_v14 = vmul.f32 %v1333_v62, %v1285_v7 }
 0x279   : > { %1384 = vadd.xlane.f32.xlu1 %v1363_v31  ;;  %1390 = vadd.xlane.f32.xlu0 %v1366_v41  ;;  %v2167_v10 = vpop.eup %2166 }
 0x27a   : > { %v1347_v8 = vmul.f32 %v1331_v5, %v1283_v4  ;;  %v1372_v19 = vmul.f32 %v2901_v50, %v1349_v14  ;;  %v1334_v22 = vadd.f32 1.0, %v2167_v10 }
 0x27b   : > { %v2169_v3 = vpop.eup %2168 }
 0x27c   : > { %v1370_v15 = vmul.f32 %v2901_v50, %v1347_v8  ;;  %v1332_v13 = vadd.f32 1.0, %v2169_v3  ;;  %v1350_v26 = vmul.f32 %v1334_v22, %v1286_v49 }
 0x27d   : > { %1392 = vadd.xlane.f32.xlu1 %v1367_v11 }
 0x27e   : > { %1398 = vadd.xlane.f32.xlu0 %v1370_v15  ;;  %v1348_v2 = vmul.f32 %v1332_v13, %v1284_v17  ;;  %v1373_v27 = vmul.f32 %v2901_v50, %v1350_v26 }
 0x280   : > { %v1371_v24 = vmul.f32 %v2901_v50, %v1348_v2 }
 0x281   : > { %1402 = vadd.xlane.f32.xlu1 %v1372_v19 }
 0x282   : > { %1396 = vadd.xlane.f32.xlu0 %v1369_v23 }
 0x285   : > { %1400 = vadd.xlane.f32.xlu1 %v1371_v24 }
 0x289   : > { %1404 = vadd.xlane.f32.xlu1 %v1373_v27 }
 0x2ee   : > { %v1379_v28 = vpop.xlane.xlu0 %1378 }
 0x2ef   : > { %v1410_v12 = vadd.f32 %v1407_v33, %v1379_v28 }
 0x2f2   : > { %v1375_v29 = vpop.xlane.xlu0 %1374 }
 0x2f3   : > { %v1408_v36 = vadd.f32 %v1407_v33, %v1375_v29 }
 0x2f6   : > { %v1381_v30 = vpop.xlane.xlu0 %1380  ;;  %v1387_v32 = vpop.xlane.xlu1 %1386 }
 0x2f7   : > { %v1411_v42 = vadd.f32 %v1407_v33, %v1381_v30  ;;  %v1414_v20 = vadd.f32 %v1407_v33, %v1387_v32 }
 0x2fa   : > { %v1377_v35 = vpop.xlane.xlu0 %1376  ;;  %v1383_v9 = vpop.xlane.xlu1 %1382 }
 0x2fb   : > { %v1409_v37 = vadd.f32 %v1407_v33, %v1377_v35  ;;  %v1412_v45 = vadd.f32 %v1407_v33, %v1383_v9 }
 0x2fd   : > { %v1424_v38 = vmax.f32 %v1408_v36, %v1409_v37 }
 0x2fe   : > { %v1389_v39 = vpop.xlane.xlu1 %1388  ;;  %v1395_v40 = vpop.xlane.xlu0 %1394 }
 0x2ff   : > { %v1425_v18 = vmax.f32 %v1424_v38, %v1410_v12  ;;  %v1415_v52 = vadd.f32 %v1407_v33, %v1389_v39  ;;  %v2956_v60 = vadd.f32 %v1407_v33, %v1395_v40 }
 0x301   : > { %v1426_v43 = vmax.f32 %v1425_v18, %v1411_v42 }
 0x302   : > { %v1385_v44 = vpop.xlane.xlu1 %1384  ;;  %v1391_v47 = vpop.xlane.xlu0 %1390 }
 0x303   : > { %v1427_v50 = vrot.slane %v1426_v43, 4  ;;  %v1413_v46 = vadd.f32 %v1407_v33, %v1385_v44  ;;  %v2950_v54 = vadd.f32 %v1407_v33, %v1391_v47 }
 0x305   : > { %v1428_v48 = vmax.f32 %v1426_v43, %v1427_v50  ;;  %v1433_v51 = vmax.f32 %v1412_v45, %v1413_v46 }
 0x306   : > { %v1393_v53 = vpop.xlane.xlu1 %1392 }
 0x307   : > { %v1429_v21 = vrot.slane %v1428_v48, 2  ;;  %v1434_v25 = vmax.f32 %v1433_v51, %v1414_v20  ;;  %v2952_v34 = vadd.f32 %v1407_v33, %v1393_v53  ;;  %v1399_v55 = vpop.xlane.xlu0 %1398 }
 0x308   : > { %v2959_v14 = vadd.f32 %v1407_v33, %v1399_v55 }
 0x309   : > { %v1430_v56 = vmax.f32 %v1428_v48, %v1429_v21  ;;  %v1435_v57 = vmax.f32 %v1434_v25, %v1415_v52  ;;  %v1442_v58 = vmax.f32 %v2950_v54, %v2952_v34 }
 0x30a   : > { %v1403_v61 = vpop.xlane.xlu1 %1402 }
 0x30b   : > { %v1431_v63 = vrot.slane %v1430_v56, 1  ;;  %v1436_v0 = vrot.slane %v1435_v57, 4  ;;  %v1397_v31 = vpop.xlane.xlu0 %1396  ;;  %v1443_v41 = vmax.f32 %v1442_v58, %v2956_v60  ;;  %v2963_v13 = vadd.f32 %v1407_v33, %v1403_v61 }
 0x30c   : > { %v1419_v1 = vadd.f32 %v1407_v33, %v1397_v31 }
 0x30d   : > { %v1432_v62 = vmax.f32 %v1430_v56, %v1431_v63  ;;  %v1437_v4 = vmax.f32 %v1435_v57, %v1436_v0 }
 0x30e   : > { %v1444_v5 = vmax.f32 %v1443_v41, %v1419_v1  ;;  %v1401_v6 = vpop.xlane.xlu1 %1400 }
 0x30f   : > { %v1460_v7 = vsub.f32 %v1408_v36, %v1432_v62  ;;  %v1461_v59 = vsub.f32 %v1409_v37, %v1432_v62  ;;  %v1462_v8 = vsub.f32 %v1410_v12, %v1432_v62  ;;  %v1463_v10 = vsub.f32 %v1411_v42, %v1432_v62 }
 0x310   : > { %v1438_v11 = vrot.slane %v1437_v4, 2  ;;  %v1445_v3 = vrot.slane %v1444_v5, 4  ;;  %v2961_v15 = vadd.f32 %v1407_v33, %v1401_v6 }
 0x311   : > { %v1476_v16 = vmul.f32 1.442695, %v1460_v7  ;;  %v1478_v17 = vmul.f32 1.442695, %v1461_v59  ;;  %v1480_v19 = vmul.f32 1.442695, %v1462_v8 }
 0x312   : > { %v1439_v2 = vmax.f32 %v1437_v4, %v1438_v11  ;;  %v1446_v22 = vmax.f32 %v1444_v5, %v1445_v3  ;;  %v1451_v23 = vmax.f32 %v2959_v14, %v2961_v15  ;;  %v1405_v49 = vpop.xlane.xlu1 %1404  ;;  %v1482_v24 = vmul.f32 1.442695, %v1463_v10 }
 0x313   : > { %2170 = vpow2.f32 %v1476_v16  ;;  %v2967_v26 = vadd.f32 %v1407_v33, %v1405_v49 }
 0x314   : > { %2172 = vpow2.f32 %v1478_v17  ;;  %v1440_v27 = vrot.slane %v1439_v2, 1  ;;  %v1447_v28 = vrot.slane %v1446_v22, 2  ;;  %v1452_v29 = vmax.f32 %v1451_v23, %v2963_v13 }
 0x315   : > { %2174 = vpow2.f32 %v1480_v19 }
 0x316   : > { %v1441_v30 = vmax.f32 %v1439_v2, %v1440_v27  ;;  %v1448_v32 = vmax.f32 %v1446_v22, %v1447_v28  ;;  %v1453_v35 = vmax.f32 %v1452_v29, %v2967_v26  ;;  %2176 = vpow2.f32 %v1482_v24 }
 0x318   : > { %v1464_v9 = vsub.f32 %v1412_v45, %v1441_v30  ;;  %v1465_v36 = vsub.f32 %v1413_v46, %v1441_v30  ;;  %v1466_v37 = vsub.f32 %v1414_v20, %v1441_v30  ;;  %v1467_v12 = vsub.f32 %v1415_v52, %v1441_v30 }
 0x319   : > { %v1449_v38 = vrot.slane %v1448_v32, 1  ;;  %v1454_v39 = vrot.slane %v1453_v35, 4 }
 0x31a   : > { %v1484_v40 = vmul.f32 1.442695, %v1464_v9  ;;  %v1486_v33 = vmul.f32 1.442695, %v1465_v36  ;;  %v1488_v42 = vmul.f32 1.442695, %v1466_v37 }
 0x31b   : > { %v1450_v18 = vmax.f32 %v1448_v32, %v1449_v38  ;;  %v1455_v43 = vmax.f32 %v1453_v35, %v1454_v39  ;;  %v1490_v44 = vmul.f32 1.442695, %v1467_v12 }
 0x31c   : > { %2178 = vpow2.f32 %v1484_v40 }
 0x31d   : > { %2180 = vpow2.f32 %v1486_v33  ;;  %v1468_v50 = vsub.f32 %v2950_v54, %v1450_v18  ;;  %v1469_v47 = vsub.f32 %v2952_v34, %v1450_v18  ;;  %v1470_v48 = vsub.f32 %v2956_v60, %v1450_v18 }
 0x31e   : > { %v1471_v45 = vsub.f32 %v1419_v1, %v1450_v18  ;;  %v1456_v46 = vrot.slane %v1455_v43, 2  ;;  %2182 = vpow2.f32 %v1488_v42 }
 0x31f   : > { %v1492_v20 = vmul.f32 1.442695, %v1468_v50  ;;  %v1494_v51 = vmul.f32 1.442695, %v1469_v47  ;;  %2184 = vpow2.f32 %v1490_v44  ;;  %v1496_v53 = vmul.f32 1.442695, %v1470_v48 }
 0x320   : > { %v2974_v52 = vpop.eup %2170  ;;  %v1457_v21 = vmax.f32 %v1455_v43, %v1456_v46  ;;  %v1498_v55 = vmul.f32 1.442695, %v1471_v45 }
 0x321   : > { %v2976_v25 = vpop.eup %2172  ;;  %2186 = vpow2.f32 %v1492_v20 }
 0x322   : > { %v1508_v54 = vadd.f32 %v2976_v25, %v2974_v52  ;;  %2188 = vpow2.f32 %v1494_v51  ;;  %v1458_v34 = vrot.slane %v1457_v21, 1  ;;  %v2980_v56 = vpop.eup %2174 }
 0x323   : > { %v2982_v57 = vpop.eup %2176  ;;  %2190 = vpow2.f32 %v1496_v53 }
 0x324   : > { %v1509_v58 = vadd.f32 %v2980_v56, %v1508_v54  ;;  %v1459_v60 = vmax.f32 %v1457_v21, %v1458_v34  ;;  %2192 = vpow2.f32 %v1498_v55  ;;  %v2210_v54 = vld [vmem:[%s2764_s4] sm:$0xff] }
 0x326   : > { %v1510_v61 = vadd.f32 %v2982_v57, %v1509_v58  ;;  %v1472_v63 = vsub.f32 %v2959_v14, %v1459_v60  ;;  %v1473_v0 = vsub.f32 %v2961_v15, %v1459_v60  ;;  %v1474_v31 = vsub.f32 %v2963_v13, %v1459_v60  ;;  %v2211_v58 = vld [vmem:[%s2764_s4 + $0x8] sm:$0xff] }
 0x327   : > { %v1475_v41 = vsub.f32 %v2967_v26, %v1459_v60 }
 0x328   : > { %v1511_v1 = vrot.slane %v1510_v61, 4  ;;  %v1500_v62 = vmul.f32 1.442695, %v1472_v63  ;;  %v1502_v4 = vmul.f32 1.442695, %v1473_v0  ;;  %v2213_v0 = vld [vmem:[%s2764_s4 + $0x18] sm:$0xff] }
 0x329   : > { %v2990_v5 = vpop.eup %2178  ;;  %v1504_v6 = vmul.f32 1.442695, %v1474_v31  ;;  %v1506_v10 = vmul.f32 1.442695, %v1475_v41 }
 0x32a   : > { %v2992_v7 = vpop.eup %2180  ;;  %v1512_v59 = vadd.f32 %v1511_v1, %v1510_v61  ;;  %2194 = vpow2.f32 %v1500_v62  ;;  %v2212_v61 = vld [vmem:[%s2764_s4 + $0x10] sm:$0xff] }
 0x32b   : > { %v1517_v8 = vadd.f32 %v2992_v7, %v2990_v5  ;;  %2196 = vpow2.f32 %v1502_v4  ;;  %v2996_v11 = vpop.eup %2182 }
 0x32c   : > { %v1513_v14 = vrot.slane %v1512_v59, 2  ;;  %v2998_v3 = vpop.eup %2184  ;;  %2198 = vpow2.f32 %v1504_v6  ;;  %v2214_v6 = vld [vmem:[%s2764_s4 + $0x20] sm:$0xff] }
 0x32d   : > { %v1518_v15 = vadd.f32 %v2996_v11, %v1517_v8  ;;  %2200 = vpow2.f32 %v1506_v10  ;;  %v2215_v8 = vld [vmem:[%s2764_s4 + $0x28] sm:$0xff] }
 0x32e   : > { %v3001_v16 = vpop.eup %2186  ;;  %v1514_v17 = vadd.f32 %v1513_v14, %v1512_v59  ;;  %v2216_v14 = vld [vmem:[%s2764_s4 + $0x30] sm:$0xff] }
 0x32f   : > { %v3003_v13 = vpop.eup %2188  ;;  %v1519_v19 = vadd.f32 %v2998_v3, %v1518_v15 }
 0x330   : > { %v1515_v2 = vrot.slane %v1514_v17, 1  ;;  %v1526_v22 = vadd.f32 %v3003_v13, %v3001_v16  ;;  %v3008_v23 = vpop.eup %2190 }
 0x331   : > { %v1520_v49 = vrot.slane %v1519_v19, 4  ;;  %v3010_v24 = vpop.eup %2192 }
 0x332   : > { %v1516_v26 = vadd.f32 %v1515_v2, %v1514_v17  ;;  %v1527_v27 = vadd.f32 %v3008_v23, %v1526_v22  ;;  %v2217_v17 = vld [vmem:[%s2764_s4 + $0x38] sm:$0xff]  ;;  %v2218_v22 = vld [vmem:[%s2764_s4 + $0x40] sm:$0xff] }
 0x333   : > { %v1521_v28 = vadd.f32 %v1520_v49, %v1519_v19 }
 0x334   : > { %2202 = vrcp.f32 %v1516_v26  ;;  %v1528_v29 = vadd.f32 %v3010_v24, %v1527_v27  ;;  %v2219_v26 = vld [vmem:[%s2764_s4 + $0x48] sm:$0xff] }
 0x335   : > { %v1522_v30 = vrot.slane %v1521_v28, 2 }
 0x336   : > { %v1529_v32 = vrot.slane %v1528_v29, 4 }
 0x337   : > { %v3014_v35 = vpop.eup %2194  ;;  %v1523_v9 = vadd.f32 %v1522_v30, %v1521_v28  ;;  %v2220_v28 = vld [vmem:[%s2764_s4 + $0x50] sm:$0xff]  ;;  %v2221_v30 = vld [vmem:[%s2764_s4 + $0x58] sm:$0xff] }
 0x338   : > { %v3016_v36 = vpop.eup %2196  ;;  %v1530_v37 = vadd.f32 %v1529_v32, %v1528_v29 }
 0x339   : > { %v1524_v12 = vrot.slane %v1523_v9, 1  ;;  %v1535_v38 = vadd.f32 %v3016_v36, %v3014_v35  ;;  %v3020_v39 = vpop.eup %2198 }
 0x33a   : > { %v1531_v40 = vrot.slane %v1530_v37, 2  ;;  %v3023_v18 = vpop.eup %2200 }
 0x33b   : > { %v1525_v33 = vadd.f32 %v1524_v12, %v1523_v9  ;;  %v1536_v42 = vadd.f32 %v3020_v39, %v1535_v38  ;;  %v2223_v12 = vld [vmem:[%s2764_s4 + $0x68] sm:$0xff]  ;;  %v2224_v38 = vld [vmem:[%s2764_s4 + $0x70] sm:$0xff] }
 0x33c   : > { %v1532_v43 = vadd.f32 %v1531_v40, %v1530_v37 }
 0x33d   : > { %2204 = vrcp.f32 %v1525_v33  ;;  %v1537_v44 = vadd.f32 %v3023_v18, %v1536_v42 }
 0x33e   : > { %v1533_v50 = vrot.slane %v1532_v43, 1 }
 0x33f   : > { %v1538_v47 = vrot.slane %v1537_v44, 4 }
 0x340   : > { %v1534_v48 = vadd.f32 %v1533_v50, %v1532_v43 }
 0x341   : > { %v2203_v45 = vpop.eup %2202  ;;  %v1539_v46 = vadd.f32 %v1538_v47, %v1537_v44 }
 0x342   : > { %v1548_v20 = vmul.f32 %v2203_v45, %v2974_v52  ;;  %v1549_v51 = vmul.f32 %v2203_v45, %v2976_v25  ;;  %v1550_v53 = vmul.f32 %v2203_v45, %v2980_v56  ;;  %v1551_v21 = vmul.f32 %v2203_v45, %v2982_v57 }
 0x343   : > { %2206 = vrcp.f32 %v1534_v48  ;;  %v1540_v55 = vrot.slane %v1539_v46, 2 }
 0x344   : > { %v1564_v34 = vmul.f32 %v2210_v54, %v1548_v20  ;;  %v1565_v60 = vmul.f32 %v2211_v58, %v1549_v51  ;;  %v1566_v63 = vmul.f32 %v2212_v61, %v1550_v53  ;;  %v1567_v31 = vmul.f32 %v2213_v0, %v1551_v21 }
 0x345   : > { %v1541_v41 = vadd.f32 %v1540_v55, %v1539_v46 }
 0x346   : > { %1580 = vst [vmem:[%s3035_s30] sm:$0xff] %v1564_v34  ;;  %1581 = vst [vmem:[%s3035_s30 + $0x8] sm:$0xff] %v1565_v60 }
 0x347   : > { %1582 = vst [vmem:[%s3035_s30 + $0x10] sm:$0xff] %v1566_v63  ;;  %1583 = vst [vmem:[%s3035_s30 + $0x18] sm:$0xff] %v1567_v31  ;;  %v1542_v52 = vrot.slane %v1541_v41, 1 }
 0x349   : > { %v1543_v25 = vadd.f32 %v1542_v52, %v1541_v41 }
 0x34a   : > { %v2205_v56 = vpop.eup %2204 }
 0x34b   : > { %v1552_v57 = vmul.f32 %v2205_v56, %v2990_v5  ;;  %v1553_v1 = vmul.f32 %v2205_v56, %v2992_v7  ;;  %v1554_v62 = vmul.f32 %v2205_v56, %v2996_v11  ;;  %v1555_v4 = vmul.f32 %v2205_v56, %v2998_v3 }
 0x34c   : > { %2208 = vrcp.f32 %v1543_v25 }
 0x34d   : > { %v1568_v59 = vmul.f32 %v2214_v6, %v1552_v57  ;;  %v1569_v10 = vmul.f32 %v2215_v8, %v1553_v1  ;;  %v1570_v15 = vmul.f32 %v2216_v14, %v1554_v62  ;;  %v1571_v19 = vmul.f32 %v2217_v17, %v1555_v4 }
 0x34f   : > { %1584 = vst [vmem:[%s3035_s30 + $0x20] sm:$0xff] %v1568_v59  ;;  %1585 = vst [vmem:[%s3035_s30 + $0x28] sm:$0xff] %v1569_v10 }
 0x350   : > { %1586 = vst [vmem:[%s3035_s30 + $0x30] sm:$0xff] %v1570_v15  ;;  %1587 = vst [vmem:[%s3035_s30 + $0x38] sm:$0xff] %v1571_v19  ;;  %v2207_v5 = vpop.eup %2206 }
 0x351   : > { %v1556_v7 = vmul.f32 %v2207_v5, %v3001_v16  ;;  %v1557_v11 = vmul.f32 %v2207_v5, %v3003_v13  ;;  %v1558_v3 = vmul.f32 %v2207_v5, %v3008_v23  ;;  %v1559_v2 = vmul.f32 %v2207_v5, %v3010_v24 }
 0x353   : > { %v1572_v49 = vmul.f32 %v2218_v22, %v1556_v7  ;;  %v1573_v27 = vmul.f32 %v2219_v26, %v1557_v11  ;;  %v1574_v29 = vmul.f32 %v2220_v28, %v1558_v3  ;;  %v1575_v32 = vmul.f32 %v2221_v30, %v1559_v2 }
 0x355   : > { %1588 = vst [vmem:[%s3035_s30 + $0x40] sm:$0xff] %v1572_v49  ;;  %1589 = vst [vmem:[%s3035_s30 + $0x48] sm:$0xff] %v1573_v27 }
 0x356   : > { %1590 = vst [vmem:[%s3035_s30 + $0x50] sm:$0xff] %v1574_v29  ;;  %1591 = vst [vmem:[%s3035_s30 + $0x58] sm:$0xff] %v1575_v32 }
 0x359   : > { %v2209_v16 = vpop.eup %2208 }
 0x35a   : > { %v1560_v13 = vmul.f32 %v2209_v16, %v3014_v35  ;;  %v1561_v23 = vmul.f32 %v2209_v16, %v3016_v36  ;;  %v1562_v24 = vmul.f32 %v2209_v16, %v3020_v39  ;;  %v1563_v9 = vmul.f32 %v2209_v16, %v3023_v18  ;;  %v2222_v35 = vld [vmem:[%s2764_s4 + $0x60] sm:$0xff]  ;;  %v2225_v39 = vld [vmem:[%s2764_s4 + $0x78] sm:$0xff] }
 0x35c   : > { %v1576_v37 = vmul.f32 %v2222_v35, %v1560_v13  ;;  %v1577_v36 = vmul.f32 %v2223_v12, %v1561_v23  ;;  %v1578_v40 = vmul.f32 %v2224_v38, %v1562_v24  ;;  %v1579_v33 = vmul.f32 %v2225_v39, %v1563_v9 }
 0x35e   : > { %1592 = vst [vmem:[%s3035_s30 + $0x60] sm:$0xff] %v1576_v37  ;;  %1593 = vst [vmem:[%s3035_s30 + $0x68] sm:$0xff] %v1577_v36 }
 0x35f   : > { %1594 = vst [vmem:[%s3035_s30 + $0x70] sm:$0xff] %v1578_v40  ;;  %1595 = vst [vmem:[%s3035_s30 + $0x78] sm:$0xff] %v1579_v33 }
 0x360   : > { %2399 = shalt.err (!%p2396_p3)
}
 0x361   : > { %s2400_s4 = scalar_lea.hbm %s3074_s26, 2048  ;;  %s2404_s16 = scalar_lea.hbm %s3138_s11, 4096 }
 0x362   : > { %p2401_p8 = scmp.ne.s32.totalorder %s3074_s26, %s2400_s4  ;;  %p2405_p7 = scmp.lt.s32.totalorder %s3074_s26, %s3138_s11 }
 0x363   : > { %p2406_p1 = scmp.lt.s32.totalorder %s2404_s16, %s2400_s4 }
 0x364   : > { %p2402_p2 = pnand %p2401_p8, %p3170_p11 }
 0x365   : > { %p2407_p13 = por %p2406_p1, %p2405_p7 }
 0x366   : > { %p2403_p9 = pneg %p2402_p2 }
 0x368   : > { %p2408_p0 = pnand %p2407_p13, %p2403_p9 }
 0x36a   : > { %2411 = shalt.err (!%p2408_p0)
}
 0x36b   : > { %s2479_s27 = smov 128   ;;  %s2480_s30 = smov 8  }
 0x36c   : > { %2028 = dma.vmem_to_hbm [thread:$0]  (%p3170_p11), %s3076_s2, 2048, %s3074_s26, %s1597_s10, %s2479_s27, %s2479_s27, %s2480_s30  }
 0x36d PF: > { %s1626_s17 = sand.u32 1, %s2454_s19   ;;  %p3171_p5 = scmp.ne.s32.totalorder %s3151_s25, 0 }
 0x36e   : > { %p3172_p12 = scmp.ge.s32.totalorder %s2466_s22, 2  ;;  %s1627_s14 = scalar_lea.sflag [#allocation5], %s1626_s17 }
 0x370   : > { %p2051_p4 = pnand %p3172_p12, %p3171_p5 }
 0x372   : > { %p2052_p6 = pneg %p2051_p4 }
 0x374   : > { %2449 = dma.done.wait (%p2052_p6), %s1627_s14, 2048  }
 0x375   : > { %2451 = vsyncadd (%p2052_p6), %s1627_s14, 4294965248  ;;  %s3173_s13 = sld [smem:[#allocation21_spill]]  ;;  %p30_p10 = scmp.ge.s32.totalorder %s2644_s29, 4  }
 0x376   : > { %s3174_s21 = sld [smem:[#allocation22_spill]]  ;;  %s3175_s19 = smov %s2458_s20 }
 0x377   : > { %s3177_s22 = smov %s2644_s29  ;;  %32 = sbr.rel (!%p30_p10) target bundleno = 16 (0x10), region = 138 }
 0x37b   : > { %s3176_s20 = smov %s3173_s13 }
 0x37c   :  { %1632 = vsyncpa [#allocation4], 1 }
 0x37d   :  { %1634 = vsyncpa [#allocation4 + $0x1], 1 }
 0x37e   :  { %1635 = vsyncpa [#allocation7], 1 }
 0x37f   :  { %1637 = vsyncpa [#allocation7 + $0x1], 1 }
 0x380   :  { %1638 = vsyncpa [#allocation10], 1 }
 0x381   :  { %1639 = vsyncpa [#allocation13], 1 }
 0x382   :  { %1640 = vsyncpa [#allocation5], 1 }
 0x383   :  { %1642 = vsyncpa [#allocation5 + $0x1], 1 }

</bundles_post_ra>
